<compile_context>
chip_gen: v5e
topology: v5e:2x2
jax: 0.10.0
libtpu: 0.0.40
codegen_flags: <defaults>
</compile_context>

<pallas_src>
import functools

import numpy as np
import jax
import jax.numpy as jnp
from jax import lax
from jax.experimental import pallas as pl
from jax.experimental.pallas import tpu as pltpu

_VMEM = pl.BlockSpec(memory_space=pltpu.MemorySpace.VMEM)
_EPS = 1e-5  # BatchNorm1d default


# ----------------------------------------------------------------------------
# In-kernel building blocks
# ----------------------------------------------------------------------------
def _linear_bn(x, w, gb, *, act=None, gain=1.0, eps=_EPS):
    """Linear (bias-free: cancelled by BN) + BatchNorm1d (batch stats) + act."""
    h = jnp.dot(x, w, preferred_element_type=jnp.float32)
    mean = jnp.mean(h, axis=0, keepdims=True)
    ex2 = jnp.mean(h * h, axis=0, keepdims=True)
    var = jnp.maximum(ex2 - mean * mean, 0.0)           # clamp f32 cancellation
    h = (h - mean) * lax.rsqrt(var + eps) * gb[0:1, :] + gb[1:2, :]
    if act == "relu":
        h = jnp.maximum(h, 0.0)
    elif act == "tanh":
        h = jnp.tanh(h)
    if gain != 1.0:
        h = h * gain
    return h


def _lstm_step(p_t, h, c, whh, H):
    """One LSTM cell step.  p_t = x_t @ W_ih + b (precomputed, hoisted)."""
    # TODO(synk): compare an unrolled VPU multiply-accumulate against this MXU
    # dot on the serial chain (latency trade; needs a bundle-count check).
    g = p_t + jnp.dot(h, whh, preferred_element_type=jnp.float32)
    gi = jax.nn.sigmoid(g[:, 0 * H:1 * H])   # gate order: i, f, g, o
    gf = jax.nn.sigmoid(g[:, 1 * H:2 * H])
    gc = jnp.tanh(g[:, 2 * H:3 * H])
    go = jax.nn.sigmoid(g[:, 3 * H:4 * H])
    c = gf * c + gi * gc
    h = go * jnp.tanh(c)
    return h, c


# ----------------------------------------------------------------------------
# Fused full-forward kernel
# ----------------------------------------------------------------------------
def _po_actor_kernel(x_ref, slab_ref, o_ref, *, layout, cfg):
    f32 = jnp.float32

    def get(name):                       # static slice of the parameter slab
        r0, nr, nc = layout[name]
        return slab_ref[r0:r0 + nr, 0:nc]

    B = x_ref.shape[0]
    s1d = cfg["s1_dim"]
    s2d, Hs, Ts, Ls = cfg["s2_dim"], cfg["s2_units"], cfg["s2_seq"], cfg["s2_layers"]
    ad, Ha, Ta, La = cfg["a_dim"], cfg["ah_units"], cfg["ah_seq"], cfg["ah_layers"]
    Hf = Hs + Ha
    Tmax = max(Ts, Ta)

    # TODO(synk): pad B to 8 rows (f32 sublane) and mask BN statistics once the
    # bundle dump shows masked sublane ops dominating; minor at B=4.
    x = x_ref[...].astype(f32)
    x_s1 = x[:, :s1d]

    # ---- lower (non-top) BiLSTM layers, per branch (batch-major sequences) --
    def lower_layers(seq, prefix, n_layers, H, T):
        for l in range(n_layers - 1):
            P = (jnp.dot(seq, get(f"{prefix}_wih_l{l}"),
                         preferred_element_type=f32) + get(f"{prefix}_b_l{l}"))
            whf = get(f"{prefix}_whf_l{l}")
            whb = get(f"{prefix}_whb_l{l}")
            z = jnp.zeros((B, H), f32)
            h_f, c_f, h_b, c_b = z, z, z, z
            fwd, bwd = [None] * T, [None] * T
            for k in range(T):           # interleave the two independent chains
                h_f, c_f = _lstm_step(P[:, k * 8 * H:k * 8 * H + 4 * H],
                                      h_f, c_f, whf, H)
                fwd[k] = h_f
                tb = T - 1 - k
                h_b, c_b = _lstm_step(P[:, tb * 8 * H + 4 * H:(tb + 1) * 8 * H],
                                      h_b, c_b, whb, H)
                bwd[tb] = h_b
            seq = jnp.concatenate(
                [v for t in range(T) for v in (fwd[t], bwd[t])], axis=1)  # [B,T*2H]
        return seq

    if Ls == 1 and La == 1:
        # Both branches single-layer: top-layer input is one contiguous lane
        # slice of raw x (batch-major [B, Ts*s2d + Ta*ad]).
        top_in = x[:, s1d:s1d + Ts * s2d + Ta * ad]
    else:
        seq_s2 = lower_layers(x[:, s1d:s1d + Ts * s2d], "s2", Ls, Hs, Ts)
        seq_ah = lower_layers(x[:, s1d + Ts * s2d:s1d + Ts * s2d + Ta * ad],
                              "ah", La, Ha, Ta)
        top_in = jnp.concatenate([seq_s2, seq_ah], axis=1)

    # ---- hoisted top-layer input projection: ONE matmul, off the chain -----
    # Columns: per fused step k the gate-interleaved [4*Hf] forward gates, then
    # the s2 / ah backward-step gates at t = T-1.
    P = jnp.dot(top_in, get("top_wih"), preferred_element_type=f32) + get("top_b")

    # ---- fused forward recurrence of BOTH top layers (one serial chain) ----
    whh = get("whh_fused")                    # [Hf, 4*Hf], gate-interleaved
    h = jnp.zeros((B, Hf), f32)
    c = jnp.zeros((B, Hf), f32)
    h_s2_f = h_ah_f = None
    for k in range(Tmax):                     # fully unrolled (small static T)
        g = (P[:, k * 4 * Hf:(k + 1) * 4 * Hf]
             + jnp.dot(h, whh, preferred_element_type=f32))
        gi = jax.nn.sigmoid(g[:, 0 * Hf:1 * Hf])
        gf = jax.nn.sigmoid(g[:, 1 * Hf:2 * Hf])
        gc = jnp.tanh(g[:, 2 * Hf:3 * Hf])
        go = jax.nn.sigmoid(g[:, 3 * Hf:4 * Hf])
        c = gf * c + gi * gc
        h = go * jnp.tanh(c)
        if k == Ts - 1:
            h_s2_f = h[:, :Hs]                # s2 forward output at t = Ts-1
        if k == Ta - 1:
            h_ah_f = h[:, Hs:]                # ah forward output at t = Ta-1

    # ---- top-layer backward direction: exactly ONE step from zero state ----
    def bwd_first_step(gates, H):
        gi = jax.nn.sigmoid(gates[:, 0 * H:1 * H])
        gc = jnp.tanh(gates[:, 2 * H:3 * H])
        go = jax.nn.sigmoid(gates[:, 3 * H:4 * H])
        return go * jnp.tanh(gi * gc)         # c0 = 0 -> forget gate irrelevant

    off_b = Tmax * 4 * Hf
    h_s2_b = bwd_first_step(P[:, off_b:off_b + 4 * Hs], Hs)
    h_ah_b = bwd_first_step(P[:, off_b + 4 * Hs:off_b + 4 * Hs + 4 * Ha], Ha)

    # ---- s1 branch + MLP head ----------------------------------------------
    h_s1 = _linear_bn(x_s1, get("s1_w"), get("s1_gb"))
    hh = jnp.concatenate([h_s1, h_s2_f, h_s2_b, h_ah_f, h_ah_b], axis=1)
    for i in range(len(cfg["middle_units"])):
        hh = _linear_bn(hh, get(f"mid{i}_w"), get(f"mid{i}_gb"), act="relu")
    y = _linear_bn(hh, get("out_w"), get("out_gb"), act="tanh",
                   gain=cfg["output_gain"])
    o_ref[...] = y


# ----------------------------------------------------------------------------
# Parameter initialization (deterministic, synthetic; matches reference init)
# ----------------------------------------------------------------------------
def _linear_bn_params(key, d_in, d_out):
    # _reset_layer_weights_bias(layer, 0.0, 0.1, 0.0): N(0, 0.1) weights, 0 bias.
    w = 0.1 * jax.random.normal(key, (d_in, d_out), jnp.float32)
    b = jnp.zeros((d_out,), jnp.float32)
    gamma = jnp.ones((d_out,), jnp.float32)   # BatchNorm1d affine defaults
    beta = jnp.zeros((d_out,), jnp.float32)
    return (w, b, gamma, beta)


def _bilstm_params(key, d_in, hidden, num_layers):
    layers = []
    for l in range(num_layers):
        din = d_in if l == 0 else 2 * hidden
        keys = jax.random.split(jax.random.fold_in(key, l), 6)
        scale = 1.0 / jnp.sqrt(hidden)
        wif = scale * jax.random.normal(keys[0], (din, 4 * hidden), jnp.float32)
        whf = scale * jax.random.normal(keys[1], (hidden, 4 * hidden), jnp.float32)
        bf = scale * jax.random.normal(keys[2], (4 * hidden,), jnp.float32)  # b_ih+b_hh
        wib = scale * jax.random.normal(keys[3], (din, 4 * hidden), jnp.float32)
        whb = scale * jax.random.normal(keys[4], (hidden, 4 * hidden), jnp.float32)
        bb = scale * jax.random.normal(keys[5], (4 * hidden,), jnp.float32)
        layers.append((wif, whf, bf, wib, whb, bb))
    return layers


def init_params(key, cfg):
    k = jax.random.split(key, 8)
    concat_dim = cfg["s1_units"] + 2 * cfg["s2_units"] + 2 * cfg["ah_units"]
    params = {
        "s1": _linear_bn_params(k[0], cfg["s1_dim"], cfg["s1_units"]),
        "s2_lstm": _bilstm_params(k[1], cfg["s2_dim"], cfg["s2_units"],
                                  cfg["s2_layers"]),
        "ah_lstm": _bilstm_params(k[2], cfg["a_dim"], cfg["ah_units"],
                                  cfg["ah_layers"]),
        "middle": [],
        "out": None,
    }
    d_in = concat_dim
    for i, d_out in enumerate(cfg["middle_units"]):
        params["middle"].append(
            _linear_bn_params(jax.random.fold_in(k[3], i), d_in, d_out))
        d_in = d_out
    params["out"] = _linear_bn_params(k[4], d_in, cfg["a_dim"])
    return params


# ----------------------------------------------------------------------------
# One-time parameter packing: ONE lane-dense slab + static layout dict
# ----------------------------------------------------------------------------
def pack_params(params, cfg):
    """Pack every weight into a single lane-dense f32 slab (built once at init).

    Includes: block-diagonal W_ih for batch-major hoisted LSTM projections, a
    combined top-layer projection matrix (both branches, fused gate layout +
    single backward-step gates), a gate-interleaved fused W_hh, and NO Linear
    biases (zero-initialised and exactly cancelled by the following BN).
    """
    Hs, Ts, Ls = cfg["s2_units"], cfg["s2_seq"], cfg["s2_layers"]
    Ha, Ta, La = cfg["ah_units"], cfg["ah_seq"], cfg["ah_layers"]
    Hf = Hs + Ha
    Tmax = max(Ts, Ta)

    entries = {}

    def add(name, arr):
        a = np.asarray(arr, np.float32)
        if a.ndim == 1:
            a = a.reshape(1, -1)
        entries[name] = a

    # s1 Linear + BN
    w, _b, gamma, beta = params["s1"]
    add("s1_w", w)
    add("s1_gb", np.stack([np.asarray(gamma), np.asarray(beta)]))

    # Lower (non-top) BiLSTM layers: per-branch block-diag W_ih + bias + W_hh.
    def add_lower(prefix, layers, d_in, H, T):
        for l in range(len(layers) - 1):
            wif, whf, bf, wib, whb, bb = [np.asarray(a) for a in layers[l]]
            din = d_in if l == 0 else 2 * H
            wih_cat = np.concatenate([wif, wib], axis=1)              # [din, 8H]
            blk = np.zeros((T * din, T * 8 * H), np.float32)
            for t in range(T):
                blk[t * din:(t + 1) * din, t * 8 * H:(t + 1) * 8 * H] = wih_cat
            add(f"{prefix}_wih_l{l}", blk)
            add(f"{prefix}_b_l{l}", np.tile(np.concatenate([bf, bb]), T))
            add(f"{prefix}_whf_l{l}", whf)
            add(f"{prefix}_whb_l{l}", whb)

    add_lower("s2", params["s2_lstm"], cfg["s2_dim"], Hs, Ts)
    add_lower("ah", params["ah_lstm"], cfg["a_dim"], Ha, Ta)

    # Combined top-layer projection (both branches): for fused step k, the
    # gate-interleaved [4*Hf] forward gates; then backward-step gates at t=T-1.
    din_s = cfg["s2_dim"] if Ls == 1 else 2 * Hs
    din_a = cfg["a_dim"] if La == 1 else 2 * Ha
    wif_s, whf_s, bf_s, wib_s, _whb_s, bb_s = [np.asarray(a) for a in params["s2_lstm"][-1]]
    wif_a, whf_a, bf_a, wib_a, _whb_a, bb_a = [np.asarray(a) for a in params["ah_lstm"][-1]]
    off_bwd = Tmax * 4 * Hf
    ncols = off_bwd + 4 * Hs + 4 * Ha
    W = np.zeros((Ts * din_s + Ta * din_a, ncols), np.float32)
    bvec = np.zeros((ncols,), np.float32)
    for t in range(Ts):
        r0 = t * din_s
        for g in range(4):
            c0 = t * 4 * Hf + g * Hf
            W[r0:r0 + din_s, c0:c0 + Hs] = wif_s[:, g * Hs:(g + 1) * Hs]
            bvec[c0:c0 + Hs] = bf_s[g * Hs:(g + 1) * Hs]
    W[(Ts - 1) * din_s:Ts * din_s, off_bwd:off_bwd + 4 * Hs] = wib_s
    bvec[off_bwd:off_bwd + 4 * Hs] = bb_s
    base = Ts * din_s
    for t in range(Ta):
        r0 = base + t * din_a
        for g in range(4):
            c0 = t * 4 * Hf + g * Hf + Hs
            W[r0:r0 + din_a, c0:c0 + Ha] = wif_a[:, g * Ha:(g + 1) * Ha]
            bvec[c0:c0 + Ha] = bf_a[g * Ha:(g + 1) * Ha]
    W[base + (Ta - 1) * din_a:base + Ta * din_a,
      off_bwd + 4 * Hs:off_bwd + 4 * Hs + 4 * Ha] = wib_a
    bvec[off_bwd + 4 * Hs:] = bb_a
    add("top_wih", W)
    add("top_b", bvec)

    # Gate-interleaved fused W_hh for the two top-layer forward chains.
    whh = np.zeros((Hf, 4 * Hf), np.float32)
    for g in range(4):
        whh[:Hs, g * Hf:g * Hf + Hs] = whf_s[:, g * Hs:(g + 1) * Hs]
        whh[Hs:, g * Hf + Hs:(g + 1) * Hf] = whf_a[:, g * Ha:(g + 1) * Ha]
    add("whh_fused", whh)

    # Middle + output Linear + BN (biases dropped, see above).
    for i, (w, _b, gamma, beta) in enumerate(params["middle"]):
        add(f"mid{i}_w", w)
        add(f"mid{i}_gb", np.stack([np.asarray(gamma), np.asarray(beta)]))
    w, _b, gamma, beta = params["out"]
    add("out_w", w)
    add("out_gb", np.stack([np.asarray(gamma), np.asarray(beta)]))

    # Assemble: 8-row-aligned offsets, lane-dense width (multiple of 128).
    width = max(a.shape[1] for a in entries.values())
    width = ((width + 127) // 128) * 128
    layout, row = {}, 0
    for name, a in entries.items():
        layout[name] = (row, a.shape[0], a.shape[1])
        row += ((a.shape[0] + 7) // 8) * 8
    slab = np.zeros((max(row, 8), width), np.float32)
    for name, a in entries.items():
        r0, r, c = layout[name]
        slab[r0:r0 + r, :c] = a
    return jnp.asarray(slab), layout


# ----------------------------------------------------------------------------
# Full forward pass: one fused pallas_call, two inputs (x, param slab)
# ----------------------------------------------------------------------------
def po_actor_forward(x, slab, *, layout, cfg):
    B = x.shape[0]
    kernel = functools.partial(_po_actor_kernel, layout=layout, cfg=cfg)
    # Gridless / single-core: total work and VMEM footprint (<1 MiB) are tiny;
    # a batch grid (dimension_semantics=("parallel",)) only pays off once B is
    # hundreds of rows per core.
    return pl.pallas_call(
        kernel,
        out_shape=jax.ShapeDtypeStruct((B, cfg["a_dim"]), jnp.float32),
        in_specs=[_VMEM, _VMEM],
        out_specs=_VMEM,
    )(x, slab)


if __name__ == "__main__":
    cfg = dict(
        s1_dim=8, s1_units=16,
        s2_dim=4, s2_units=8, s2_seq=6, s2_layers=1,
        a_dim=3, ah_units=8, ah_seq=5, ah_layers=1,
        middle_units=[32, 16],        # middle_layers_num = 2, ReLU activations
        output_gain=2.0,              # output_layer_func = Tanh
    )
    batch = 4
    in_dim = (cfg["s1_dim"] + cfg["s2_dim"] * cfg["s2_seq"]
              + cfg["a_dim"] * cfg["ah_seq"])

    key = jax.random.PRNGKey(0)
    k_x, k_p = jax.random.split(key)
    x = jax.random.normal(k_x, (batch, in_dim), jnp.float32)
    params = init_params(k_p, cfg)
    slab, layout = pack_params(params, cfg)          # once, outside jit

    fwd = jax.jit(functools.partial(po_actor_forward, layout=layout, cfg=cfg))
    y = fwd(x, slab)
    jax.block_until_ready(y)
    assert y.shape == (batch, cfg["a_dim"])
    assert bool(jnp.all(jnp.isfinite(y)))
    print("KERNEL_OK")
</pallas_src>

<mosaic_0001>
module attributes {stable_mosaic.version = 11 : i64} {
  func.func @_po_actor_kernel(%arg0: memref<4x47xf32, #tpu.memory_space<vmem>>, %arg1: memref<200x512xf32, #tpu.memory_space<vmem>>, %arg2: memref<4x3xf32, #tpu.memory_space<vmem>>) attributes {dimension_semantics = [], scalar_prefetch = 0 : i64, scratch_operands = 0 : i64, tpu.core_type = #tpu.core_type<tc>} {
    %c0 = arith.constant 0 : index
    %c0_0 = arith.constant 0 : index
    %0 = vector.load %arg0[%c0, %c0_0] : memref<4x47xf32, #tpu.memory_space<vmem>>, vector<4x47xf32>
    %1 = vector.extract_strided_slice %0 {offsets = [0, 0], sizes = [4, 8], strides = [1, 1]} : vector<4x47xf32> to vector<4x8xf32>
    %2 = vector.extract_strided_slice %0 {offsets = [0, 8], sizes = [4, 39], strides = [1, 1]} : vector<4x47xf32> to vector<4x39xf32>
    %c16 = arith.constant 16 : index
    %c0_1 = arith.constant 0 : index
    %3 = vector.load %arg1[%c16, %c0_1] : memref<200x512xf32, #tpu.memory_space<vmem>>, vector<39x448xf32>
    %cst = arith.constant dense<0.000000e+00> : vector<4x448xf32>
    %4 = tpu.matmul %2, %3, %cst {dimension_numbers = #tpu.dot_dimension_numbers<[1], [0], [0], [1], [0, 0, 1, 1], [], []>} : vector<4x39xf32>, vector<39x448xf32>, vector<4x448xf32> -> vector<4x448xf32>
    %c56 = arith.constant 56 : index
    %c0_2 = arith.constant 0 : index
    %5 = vector.load %arg1[%c56, %c0_2] : memref<200x512xf32, #tpu.memory_space<vmem>>, vector<1x448xf32>
    %6 = vector.broadcast %5 : vector<1x448xf32> to vector<4x448xf32>
    %7 = arith.addf %4, %6 : vector<4x448xf32>
    %c64 = arith.constant 64 : index
    %c0_3 = arith.constant 0 : index
    %8 = vector.load %arg1[%c64, %c0_3] : memref<200x512xf32, #tpu.memory_space<vmem>>, vector<16x64xf32>
    %cst_4 = arith.constant 0.000000e+00 : f32
    %9 = vector.broadcast %cst_4 : f32 to vector<4x16xf32>
    %cst_5 = arith.constant 0.000000e+00 : f32
    %10 = vector.broadcast %cst_5 : f32 to vector<4x16xf32>
    %11 = vector.extract_strided_slice %7 {offsets = [0, 0], sizes = [4, 64], strides = [1, 1]} : vector<4x448xf32> to vector<4x64xf32>
    %cst_6 = arith.constant dense<0.000000e+00> : vector<4x64xf32>
    %12 = tpu.matmul %9, %8, %cst_6 {dimension_numbers = #tpu.dot_dimension_numbers<[1], [0], [0], [1], [0, 0, 1, 1], [], []>} : vector<4x16xf32>, vector<16x64xf32>, vector<4x64xf32> -> vector<4x64xf32>
    %13 = arith.addf %11, %12 : vector<4x64xf32>
    %14 = vector.extract_strided_slice %13 {offsets = [0, 0], sizes = [4, 16], strides = [1, 1]} : vector<4x64xf32> to vector<4x16xf32>
    %15 = arith.negf %14 : vector<4x16xf32>
    %16 = math.exp %15 : vector<4x16xf32>
    %cst_7 = arith.constant 1.000000e+00 : f32
    %17 = vector.broadcast %cst_7 : f32 to vector<4x16xf32>
    %18 = arith.addf %17, %16 : vector<4x16xf32>
    %19 = arith.divf %17, %18 : vector<4x16xf32>
    %20 = vector.extract_strided_slice %13 {offsets = [0, 16], sizes = [4, 16], strides = [1, 1]} : vector<4x64xf32> to vector<4x16xf32>
    %21 = arith.negf %20 : vector<4x16xf32>
    %22 = math.exp %21 : vector<4x16xf32>
    %cst_8 = arith.constant 1.000000e+00 : f32
    %23 = vector.broadcast %cst_8 : f32 to vector<4x16xf32>
    %24 = arith.addf %23, %22 : vector<4x16xf32>
    %25 = arith.divf %23, %24 : vector<4x16xf32>
    %26 = vector.extract_strided_slice %13 {offsets = [0, 32], sizes = [4, 16], strides = [1, 1]} : vector<4x64xf32> to vector<4x16xf32>
    %27 = math.tanh %26 : vector<4x16xf32>
    %28 = vector.extract_strided_slice %13 {offsets = [0, 48], sizes = [4, 16], strides = [1, 1]} : vector<4x64xf32> to vector<4x16xf32>
    %29 = arith.negf %28 : vector<4x16xf32>
    %30 = math.exp %29 : vector<4x16xf32>
    %cst_9 = arith.constant 1.000000e+00 : f32
    %31 = vector.broadcast %cst_9 : f32 to vector<4x16xf32>
    %32 = arith.addf %31, %30 : vector<4x16xf32>
    %33 = arith.divf %31, %32 : vector<4x16xf32>
    %34 = arith.mulf %25, %10 : vector<4x16xf32>
    %35 = arith.mulf %19, %27 : vector<4x16xf32>
    %36 = arith.addf %34, %35 : vector<4x16xf32>
    %37 = math.tanh %36 : vector<4x16xf32>
    %38 = arith.mulf %33, %37 : vector<4x16xf32>
    %39 = vector.extract_strided_slice %7 {offsets = [0, 64], sizes = [4, 64], strides = [1, 1]} : vector<4x448xf32> to vector<4x64xf32>
    %cst_10 = arith.constant dense<0.000000e+00> : vector<4x64xf32>
    %40 = tpu.matmul %38, %8, %cst_10 {dimension_numbers = #tpu.dot_dimension_numbers<[1], [0], [0], [1], [0, 0, 1, 1], [], []>} : vector<4x16xf32>, vector<16x64xf32>, vector<4x64xf32> -> vector<4x64xf32>
    %41 = arith.addf %39, %40 : vector<4x64xf32>
    %42 = vector.extract_strided_slice %41 {offsets = [0, 0], sizes = [4, 16], strides = [1, 1]} : vector<4x64xf32> to vector<4x16xf32>
    %43 = arith.negf %42 : vector<4x16xf32>
    %44 = math.exp %43 : vector<4x16xf32>
    %cst_11 = arith.constant 1.000000e+00 : f32
    %45 = vector.broadcast %cst_11 : f32 to vector<4x16xf32>
    %46 = arith.addf %45, %44 : vector<4x16xf32>
    %47 = arith.divf %45, %46 : vector<4x16xf32>
    %48 = vector.extract_strided_slice %41 {offsets = [0, 16], sizes = [4, 16], strides = [1, 1]} : vector<4x64xf32> to vector<4x16xf32>
    %49 = arith.negf %48 : vector<4x16xf32>
    %50 = math.exp %49 : vector<4x16xf32>
    %cst_12 = arith.constant 1.000000e+00 : f32
    %51 = vector.broadcast %cst_12 : f32 to vector<4x16xf32>
    %52 = arith.addf %51, %50 : vector<4x16xf32>
    %53 = arith.divf %51, %52 : vector<4x16xf32>
    %54 = vector.extract_strided_slice %41 {offsets = [0, 32], sizes = [4, 16], strides = [1, 1]} : vector<4x64xf32> to vector<4x16xf32>
    %55 = math.tanh %54 : vector<4x16xf32>
    %56 = vector.extract_strided_slice %41 {offsets = [0, 48], sizes = [4, 16], strides = [1, 1]} : vector<4x64xf32> to vector<4x16xf32>
    %57 = arith.negf %56 : vector<4x16xf32>
    %58 = math.exp %57 : vector<4x16xf32>
    %cst_13 = arith.constant 1.000000e+00 : f32
    %59 = vector.broadcast %cst_13 : f32 to vector<4x16xf32>
    %60 = arith.addf %59, %58 : vector<4x16xf32>
    %61 = arith.divf %59, %60 : vector<4x16xf32>
    %62 = arith.mulf %53, %36 : vector<4x16xf32>
    %63 = arith.mulf %47, %55 : vector<4x16xf32>
    %64 = arith.addf %62, %63 : vector<4x16xf32>
    %65 = math.tanh %64 : vector<4x16xf32>
    %66 = arith.mulf %61, %65 : vector<4x16xf32>
    %67 = vector.extract_strided_slice %7 {offsets = [0, 128], sizes = [4, 64], strides = [1, 1]} : vector<4x448xf32> to vector<4x64xf32>
    %cst_14 = arith.constant dense<0.000000e+00> : vector<4x64xf32>
    %68 = tpu.matmul %66, %8, %cst_14 {dimension_numbers = #tpu.dot_dimension_numbers<[1], [0], [0], [1], [0, 0, 1, 1], [], []>} : vector<4x16xf32>, vector<16x64xf32>, vector<4x64xf32> -> vector<4x64xf32>
    %69 = arith.addf %67, %68 : vector<4x64xf32>
    %70 = vector.extract_strided_slice %69 {offsets = [0, 0], sizes = [4, 16], strides = [1, 1]} : vector<4x64xf32> to vector<4x16xf32>
    %71 = arith.negf %70 : vector<4x16xf32>
    %72 = math.exp %71 : vector<4x16xf32>
    %cst_15 = arith.constant 1.000000e+00 : f32
    %73 = vector.broadcast %cst_15 : f32 to vector<4x16xf32>
    %74 = arith.addf %73, %72 : vector<4x16xf32>
    %75 = arith.divf %73, %74 : vector<4x16xf32>
    %76 = vector.extract_strided_slice %69 {offsets = [0, 16], sizes = [4, 16], strides = [1, 1]} : vector<4x64xf32> to vector<4x16xf32>
    %77 = arith.negf %76 : vector<4x16xf32>
    %78 = math.exp %77 : vector<4x16xf32>
    %cst_16 = arith.constant 1.000000e+00 : f32
    %79 = vector.broadcast %cst_16 : f32 to vector<4x16xf32>
    %80 = arith.addf %79, %78 : vector<4x16xf32>
    %81 = arith.divf %79, %80 : vector<4x16xf32>
    %82 = vector.extract_strided_slice %69 {offsets = [0, 32], sizes = [4, 16], strides = [1, 1]} : vector<4x64xf32> to vector<4x16xf32>
    %83 = math.tanh %82 : vector<4x16xf32>
    %84 = vector.extract_strided_slice %69 {offsets = [0, 48], sizes = [4, 16], strides = [1, 1]} : vector<4x64xf32> to vector<4x16xf32>
    %85 = arith.negf %84 : vector<4x16xf32>
    %86 = math.exp %85 : vector<4x16xf32>
    %cst_17 = arith.constant 1.000000e+00 : f32
    %87 = vector.broadcast %cst_17 : f32 to vector<4x16xf32>
    %88 = arith.addf %87, %86 : vector<4x16xf32>
    %89 = arith.divf %87, %88 : vector<4x16xf32>
    %90 = arith.mulf %81, %64 : vector<4x16xf32>
    %91 = arith.mulf %75, %83 : vector<4x16xf32>
    %92 = arith.addf %90, %91 : vector<4x16xf32>
    %93 = math.tanh %92 : vector<4x16xf32>
    %94 = arith.mulf %89, %93 : vector<4x16xf32>
    %95 = vector.extract_strided_slice %7 {offsets = [0, 192], sizes = [4, 64], strides = [1, 1]} : vector<4x448xf32> to vector<4x64xf32>
    %cst_18 = arith.constant dense<0.000000e+00> : vector<4x64xf32>
    %96 = tpu.matmul %94, %8, %cst_18 {dimension_numbers = #tpu.dot_dimension_numbers<[1], [0], [0], [1], [0, 0, 1, 1], [], []>} : vector<4x16xf32>, vector<16x64xf32>, vector<4x64xf32> -> vector<4x64xf32>
    %97 = arith.addf %95, %96 : vector<4x64xf32>
    %98 = vector.extract_strided_slice %97 {offsets = [0, 0], sizes = [4, 16], strides = [1, 1]} : vector<4x64xf32> to vector<4x16xf32>
    %99 = arith.negf %98 : vector<4x16xf32>
    %100 = math.exp %99 : vector<4x16xf32>
    %cst_19 = arith.constant 1.000000e+00 : f32
    %101 = vector.broadcast %cst_19 : f32 to vector<4x16xf32>
    %102 = arith.addf %101, %100 : vector<4x16xf32>
    %103 = arith.divf %101, %102 : vector<4x16xf32>
    %104 = vector.extract_strided_slice %97 {offsets = [0, 16], sizes = [4, 16], strides = [1, 1]} : vector<4x64xf32> to vector<4x16xf32>
    %105 = arith.negf %104 : vector<4x16xf32>
    %106 = math.exp %105 : vector<4x16xf32>
    %cst_20 = arith.constant 1.000000e+00 : f32
    %107 = vector.broadcast %cst_20 : f32 to vector<4x16xf32>
    %108 = arith.addf %107, %106 : vector<4x16xf32>
    %109 = arith.divf %107, %108 : vector<4x16xf32>
    %110 = vector.extract_strided_slice %97 {offsets = [0, 32], sizes = [4, 16], strides = [1, 1]} : vector<4x64xf32> to vector<4x16xf32>
    %111 = math.tanh %110 : vector<4x16xf32>
    %112 = vector.extract_strided_slice %97 {offsets = [0, 48], sizes = [4, 16], strides = [1, 1]} : vector<4x64xf32> to vector<4x16xf32>
    %113 = arith.negf %112 : vector<4x16xf32>
    %114 = math.exp %113 : vector<4x16xf32>
    %cst_21 = arith.constant 1.000000e+00 : f32
    %115 = vector.broadcast %cst_21 : f32 to vector<4x16xf32>
    %116 = arith.addf %115, %114 : vector<4x16xf32>
    %117 = arith.divf %115, %116 : vector<4x16xf32>
    %118 = arith.mulf %109, %92 : vector<4x16xf32>
    %119 = arith.mulf %103, %111 : vector<4x16xf32>
    %120 = arith.addf %118, %119 : vector<4x16xf32>
    %121 = math.tanh %120 : vector<4x16xf32>
    %122 = arith.mulf %117, %121 : vector<4x16xf32>
    %123 = vector.extract_strided_slice %7 {offsets = [0, 256], sizes = [4, 64], strides = [1, 1]} : vector<4x448xf32> to vector<4x64xf32>
    %cst_22 = arith.constant dense<0.000000e+00> : vector<4x64xf32>
    %124 = tpu.matmul %122, %8, %cst_22 {dimension_numbers = #tpu.dot_dimension_numbers<[1], [0], [0], [1], [0, 0, 1, 1], [], []>} : vector<4x16xf32>, vector<16x64xf32>, vector<4x64xf32> -> vector<4x64xf32>
    %125 = arith.addf %123, %124 : vector<4x64xf32>
    %126 = vector.extract_strided_slice %125 {offsets = [0, 0], sizes = [4, 16], strides = [1, 1]} : vector<4x64xf32> to vector<4x16xf32>
    %127 = arith.negf %126 : vector<4x16xf32>
    %128 = math.exp %127 : vector<4x16xf32>
    %cst_23 = arith.constant 1.000000e+00 : f32
    %129 = vector.broadcast %cst_23 : f32 to vector<4x16xf32>
    %130 = arith.addf %129, %128 : vector<4x16xf32>
    %131 = arith.divf %129, %130 : vector<4x16xf32>
    %132 = vector.extract_strided_slice %125 {offsets = [0, 16], sizes = [4, 16], strides = [1, 1]} : vector<4x64xf32> to vector<4x16xf32>
    %133 = arith.negf %132 : vector<4x16xf32>
    %134 = math.exp %133 : vector<4x16xf32>
    %cst_24 = arith.constant 1.000000e+00 : f32
    %135 = vector.broadcast %cst_24 : f32 to vector<4x16xf32>
    %136 = arith.addf %135, %134 : vector<4x16xf32>
    %137 = arith.divf %135, %136 : vector<4x16xf32>
    %138 = vector.extract_strided_slice %125 {offsets = [0, 32], sizes = [4, 16], strides = [1, 1]} : vector<4x64xf32> to vector<4x16xf32>
    %139 = math.tanh %138 : vector<4x16xf32>
    %140 = vector.extract_strided_slice %125 {offsets = [0, 48], sizes = [4, 16], strides = [1, 1]} : vector<4x64xf32> to vector<4x16xf32>
    %141 = arith.negf %140 : vector<4x16xf32>
    %142 = math.exp %141 : vector<4x16xf32>
    %cst_25 = arith.constant 1.000000e+00 : f32
    %143 = vector.broadcast %cst_25 : f32 to vector<4x16xf32>
    %144 = arith.addf %143, %142 : vector<4x16xf32>
    %145 = arith.divf %143, %144 : vector<4x16xf32>
    %146 = arith.mulf %137, %120 : vector<4x16xf32>
    %147 = arith.mulf %131, %139 : vector<4x16xf32>
    %148 = arith.addf %146, %147 : vector<4x16xf32>
    %149 = math.tanh %148 : vector<4x16xf32>
    %150 = arith.mulf %145, %149 : vector<4x16xf32>
    %151 = vector.extract_strided_slice %150 {offsets = [0, 8], sizes = [4, 8], strides = [1, 1]} : vector<4x16xf32> to vector<4x8xf32>
    %152 = vector.extract_strided_slice %7 {offsets = [0, 320], sizes = [4, 64], strides = [1, 1]} : vector<4x448xf32> to vector<4x64xf32>
    %cst_26 = arith.constant dense<0.000000e+00> : vector<4x64xf32>
    %153 = tpu.matmul %150, %8, %cst_26 {dimension_numbers = #tpu.dot_dimension_numbers<[1], [0], [0], [1], [0, 0, 1, 1], [], []>} : vector<4x16xf32>, vector<16x64xf32>, vector<4x64xf32> -> vector<4x64xf32>
    %154 = arith.addf %152, %153 : vector<4x64xf32>
    %155 = vector.extract_strided_slice %154 {offsets = [0, 0], sizes = [4, 16], strides = [1, 1]} : vector<4x64xf32> to vector<4x16xf32>
    %156 = arith.negf %155 : vector<4x16xf32>
    %157 = math.exp %156 : vector<4x16xf32>
    %cst_27 = arith.constant 1.000000e+00 : f32
    %158 = vector.broadcast %cst_27 : f32 to vector<4x16xf32>
    %159 = arith.addf %158, %157 : vector<4x16xf32>
    %160 = arith.divf %158, %159 : vector<4x16xf32>
    %161 = vector.extract_strided_slice %154 {offsets = [0, 16], sizes = [4, 16], strides = [1, 1]} : vector<4x64xf32> to vector<4x16xf32>
    %162 = arith.negf %161 : vector<4x16xf32>
    %163 = math.exp %162 : vector<4x16xf32>
    %cst_28 = arith.constant 1.000000e+00 : f32
    %164 = vector.broadcast %cst_28 : f32 to vector<4x16xf32>
    %165 = arith.addf %164, %163 : vector<4x16xf32>
    %166 = arith.divf %164, %165 : vector<4x16xf32>
    %167 = vector.extract_strided_slice %154 {offsets = [0, 32], sizes = [4, 16], strides = [1, 1]} : vector<4x64xf32> to vector<4x16xf32>
    %168 = math.tanh %167 : vector<4x16xf32>
    %169 = vector.extract_strided_slice %154 {offsets = [0, 48], sizes = [4, 16], strides = [1, 1]} : vector<4x64xf32> to vector<4x16xf32>
    %170 = arith.negf %169 : vector<4x16xf32>
    %171 = math.exp %170 : vector<4x16xf32>
    %cst_29 = arith.constant 1.000000e+00 : f32
    %172 = vector.broadcast %cst_29 : f32 to vector<4x16xf32>
    %173 = arith.addf %172, %171 : vector<4x16xf32>
    %174 = arith.divf %172, %173 : vector<4x16xf32>
    %175 = arith.mulf %166, %148 : vector<4x16xf32>
    %176 = arith.mulf %160, %168 : vector<4x16xf32>
    %177 = arith.addf %175, %176 : vector<4x16xf32>
    %178 = math.tanh %177 : vector<4x16xf32>
    %179 = arith.mulf %174, %178 : vector<4x16xf32>
    %180 = vector.extract_strided_slice %179 {offsets = [0, 0], sizes = [4, 8], strides = [1, 1]} : vector<4x16xf32> to vector<4x8xf32>
    %181 = vector.extract_strided_slice %7 {offsets = [0, 384], sizes = [4, 32], strides = [1, 1]} : vector<4x448xf32> to vector<4x32xf32>
    %182 = vector.extract_strided_slice %181 {offsets = [0, 0], sizes = [4, 8], strides = [1, 1]} : vector<4x32xf32> to vector<4x8xf32>
    %183 = arith.negf %182 : vector<4x8xf32>
    %184 = math.exp %183 : vector<4x8xf32>
    %cst_30 = arith.constant 1.000000e+00 : f32
    %185 = vector.broadcast %cst_30 : f32 to vector<4x8xf32>
    %186 = arith.addf %185, %184 : vector<4x8xf32>
    %187 = arith.divf %185, %186 : vector<4x8xf32>
    %188 = vector.extract_strided_slice %181 {offsets = [0, 16], sizes = [4, 8], strides = [1, 1]} : vector<4x32xf32> to vector<4x8xf32>
    %189 = math.tanh %188 : vector<4x8xf32>
    %190 = vector.extract_strided_slice %181 {offsets = [0, 24], sizes = [4, 8], strides = [1, 1]} : vector<4x32xf32> to vector<4x8xf32>
    %191 = arith.negf %190 : vector<4x8xf32>
    %192 = math.exp %191 : vector<4x8xf32>
    %cst_31 = arith.constant 1.000000e+00 : f32
    %193 = vector.broadcast %cst_31 : f32 to vector<4x8xf32>
    %194 = arith.addf %193, %192 : vector<4x8xf32>
    %195 = arith.divf %193, %194 : vector<4x8xf32>
    %196 = arith.mulf %187, %189 : vector<4x8xf32>
    %197 = math.tanh %196 : vector<4x8xf32>
    %198 = arith.mulf %195, %197 : vector<4x8xf32>
    %199 = vector.extract_strided_slice %7 {offsets = [0, 416], sizes = [4, 32], strides = [1, 1]} : vector<4x448xf32> to vector<4x32xf32>
    %200 = vector.extract_strided_slice %199 {offsets = [0, 0], sizes = [4, 8], strides = [1, 1]} : vector<4x32xf32> to vector<4x8xf32>
    %201 = arith.negf %200 : vector<4x8xf32>
    %202 = math.exp %201 : vector<4x8xf32>
    %cst_32 = arith.constant 1.000000e+00 : f32
    %203 = vector.broadcast %cst_32 : f32 to vector<4x8xf32>
    %204 = arith.addf %203, %202 : vector<4x8xf32>
    %205 = arith.divf %203, %204 : vector<4x8xf32>
    %206 = vector.extract_strided_slice %199 {offsets = [0, 16], sizes = [4, 8], strides = [1, 1]} : vector<4x32xf32> to vector<4x8xf32>
    %207 = math.tanh %206 : vector<4x8xf32>
    %208 = vector.extract_strided_slice %199 {offsets = [0, 24], sizes = [4, 8], strides = [1, 1]} : vector<4x32xf32> to vector<4x8xf32>
    %209 = arith.negf %208 : vector<4x8xf32>
    %210 = math.exp %209 : vector<4x8xf32>
    %cst_33 = arith.constant 1.000000e+00 : f32
    %211 = vector.broadcast %cst_33 : f32 to vector<4x8xf32>
    %212 = arith.addf %211, %210 : vector<4x8xf32>
    %213 = arith.divf %211, %212 : vector<4x8xf32>
    %214 = arith.mulf %205, %207 : vector<4x8xf32>
    %215 = math.tanh %214 : vector<4x8xf32>
    %216 = arith.mulf %213, %215 : vector<4x8xf32>
    %c0_34 = arith.constant 0 : index
    %c0_35 = arith.constant 0 : index
    %217 = vector.load %arg1[%c0_34, %c0_35] : memref<200x512xf32, #tpu.memory_space<vmem>>, vector<8x16xf32>
    %c8 = arith.constant 8 : index
    %c0_36 = arith.constant 0 : index
    %218 = vector.load %arg1[%c8, %c0_36] : memref<200x512xf32, #tpu.memory_space<vmem>>, vector<2x16xf32>
    %cst_37 = arith.constant dense<0.000000e+00> : vector<4x16xf32>
    %219 = tpu.matmul %1, %217, %cst_37 {dimension_numbers = #tpu.dot_dimension_numbers<[1], [0], [0], [1], [0, 0, 1, 1], [], []>} : vector<4x8xf32>, vector<8x16xf32>, vector<4x16xf32> -> vector<4x16xf32>
    %cst_38 = arith.constant dense<0.000000e+00> : vector<16xf32>
    %220 = vector.multi_reduction <add>, %219, %cst_38 [0] : vector<4x16xf32> to vector<16xf32>
    %221 = vector.shape_cast %220 : vector<16xf32> to vector<1x16xf32>
    %cst_39 = arith.constant 4.000000e+00 : f32
    %222 = vector.broadcast %cst_39 : f32 to vector<1x16xf32>
    %223 = arith.divf %221, %222 : vector<1x16xf32>
    %224 = arith.mulf %219, %219 : vector<4x16xf32>
    %cst_40 = arith.constant dense<0.000000e+00> : vector<16xf32>
    %225 = vector.multi_reduction <add>, %224, %cst_40 [0] : vector<4x16xf32> to vector<16xf32>
    %226 = vector.shape_cast %225 : vector<16xf32> to vector<1x16xf32>
    %cst_41 = arith.constant 4.000000e+00 : f32
    %227 = vector.broadcast %cst_41 : f32 to vector<1x16xf32>
    %228 = arith.divf %226, %227 : vector<1x16xf32>
    %229 = arith.mulf %223, %223 : vector<1x16xf32>
    %230 = arith.subf %228, %229 : vector<1x16xf32>
    %cst_42 = arith.constant 0.000000e+00 : f32
    %231 = vector.broadcast %cst_42 : f32 to vector<1x16xf32>
    %232 = arith.maximumf %230, %231 : vector<1x16xf32>
    %233 = vector.broadcast %223 : vector<1x16xf32> to vector<4x16xf32>
    %234 = arith.subf %219, %233 : vector<4x16xf32>
    %cst_43 = arith.constant 9.99999974E-6 : f32
    %235 = vector.broadcast %cst_43 : f32 to vector<1x16xf32>
    %236 = arith.addf %232, %235 : vector<1x16xf32>
    %237 = math.rsqrt %236 : vector<1x16xf32>
    %238 = vector.broadcast %237 : vector<1x16xf32> to vector<4x16xf32>
    %239 = arith.mulf %234, %238 : vector<4x16xf32>
    %240 = vector.extract_strided_slice %218 {offsets = [0, 0], sizes = [1, 16], strides = [1, 1]} : vector<2x16xf32> to vector<1x16xf32>
    %241 = vector.broadcast %240 : vector<1x16xf32> to vector<4x16xf32>
    %242 = arith.mulf %239, %241 : vector<4x16xf32>
    %243 = vector.extract_strided_slice %218 {offsets = [1, 0], sizes = [1, 16], strides = [1, 1]} : vector<2x16xf32> to vector<1x16xf32>
    %244 = vector.broadcast %243 : vector<1x16xf32> to vector<4x16xf32>
    %245 = arith.addf %242, %244 : vector<4x16xf32>
    %246 = tpu.concatenate %245, %180, %198, %151, %216 in 1 : vector<4x16xf32>, vector<4x8xf32>, vector<4x8xf32>, vector<4x8xf32>, vector<4x8xf32> -> vector<4x48xf32>
    %c80 = arith.constant 80 : index
    %c0_44 = arith.constant 0 : index
    %247 = vector.load %arg1[%c80, %c0_44] : memref<200x512xf32, #tpu.memory_space<vmem>>, vector<48x32xf32>
    %c128 = arith.constant 128 : index
    %c0_45 = arith.constant 0 : index
    %248 = vector.load %arg1[%c128, %c0_45] : memref<200x512xf32, #tpu.memory_space<vmem>>, vector<2x32xf32>
    %cst_46 = arith.constant dense<0.000000e+00> : vector<4x32xf32>
    %249 = tpu.matmul %246, %247, %cst_46 {dimension_numbers = #tpu.dot_dimension_numbers<[1], [0], [0], [1], [0, 0, 1, 1], [], []>} : vector<4x48xf32>, vector<48x32xf32>, vector<4x32xf32> -> vector<4x32xf32>
    %cst_47 = arith.constant dense<0.000000e+00> : vector<32xf32>
    %250 = vector.multi_reduction <add>, %249, %cst_47 [0] : vector<4x32xf32> to vector<32xf32>
    %251 = vector.shape_cast %250 : vector<32xf32> to vector<1x32xf32>
    %cst_48 = arith.constant 4.000000e+00 : f32
    %252 = vector.broadcast %cst_48 : f32 to vector<1x32xf32>
    %253 = arith.divf %251, %252 : vector<1x32xf32>
    %254 = arith.mulf %249, %249 : vector<4x32xf32>
    %cst_49 = arith.constant dense<0.000000e+00> : vector<32xf32>
    %255 = vector.multi_reduction <add>, %254, %cst_49 [0] : vector<4x32xf32> to vector<32xf32>
    %256 = vector.shape_cast %255 : vector<32xf32> to vector<1x32xf32>
    %cst_50 = arith.constant 4.000000e+00 : f32
    %257 = vector.broadcast %cst_50 : f32 to vector<1x32xf32>
    %258 = arith.divf %256, %257 : vector<1x32xf32>
    %259 = arith.mulf %253, %253 : vector<1x32xf32>
    %260 = arith.subf %258, %259 : vector<1x32xf32>
    %cst_51 = arith.constant 0.000000e+00 : f32
    %261 = vector.broadcast %cst_51 : f32 to vector<1x32xf32>
    %262 = arith.maximumf %260, %261 : vector<1x32xf32>
    %263 = vector.broadcast %253 : vector<1x32xf32> to vector<4x32xf32>
    %264 = arith.subf %249, %263 : vector<4x32xf32>
    %cst_52 = arith.constant 9.99999974E-6 : f32
    %265 = vector.broadcast %cst_52 : f32 to vector<1x32xf32>
    %266 = arith.addf %262, %265 : vector<1x32xf32>
    %267 = math.rsqrt %266 : vector<1x32xf32>
    %268 = vector.broadcast %267 : vector<1x32xf32> to vector<4x32xf32>
    %269 = arith.mulf %264, %268 : vector<4x32xf32>
    %270 = vector.extract_strided_slice %248 {offsets = [0, 0], sizes = [1, 32], strides = [1, 1]} : vector<2x32xf32> to vector<1x32xf32>
    %271 = vector.broadcast %270 : vector<1x32xf32> to vector<4x32xf32>
    %272 = arith.mulf %269, %271 : vector<4x32xf32>
    %273 = vector.extract_strided_slice %248 {offsets = [1, 0], sizes = [1, 32], strides = [1, 1]} : vector<2x32xf32> to vector<1x32xf32>
    %274 = vector.broadcast %273 : vector<1x32xf32> to vector<4x32xf32>
    %275 = arith.addf %272, %274 : vector<4x32xf32>
    %cst_53 = arith.constant 0.000000e+00 : f32
    %276 = vector.broadcast %cst_53 : f32 to vector<4x32xf32>
    %277 = arith.maximumf %275, %276 : vector<4x32xf32>
    %c136 = arith.constant 136 : index
    %c0_54 = arith.constant 0 : index
    %278 = vector.load %arg1[%c136, %c0_54] : memref<200x512xf32, #tpu.memory_space<vmem>>, vector<32x16xf32>
    %c168 = arith.constant 168 : index
    %c0_55 = arith.constant 0 : index
    %279 = vector.load %arg1[%c168, %c0_55] : memref<200x512xf32, #tpu.memory_space<vmem>>, vector<2x16xf32>
    %cst_56 = arith.constant dense<0.000000e+00> : vector<4x16xf32>
    %280 = tpu.matmul %277, %278, %cst_56 {dimension_numbers = #tpu.dot_dimension_numbers<[1], [0], [0], [1], [0, 0, 1, 1], [], []>} : vector<4x32xf32>, vector<32x16xf32>, vector<4x16xf32> -> vector<4x16xf32>
    %cst_57 = arith.constant dense<0.000000e+00> : vector<16xf32>
    %281 = vector.multi_reduction <add>, %280, %cst_57 [0] : vector<4x16xf32> to vector<16xf32>
    %282 = vector.shape_cast %281 : vector<16xf32> to vector<1x16xf32>
    %cst_58 = arith.constant 4.000000e+00 : f32
    %283 = vector.broadcast %cst_58 : f32 to vector<1x16xf32>
    %284 = arith.divf %282, %283 : vector<1x16xf32>
    %285 = arith.mulf %280, %280 : vector<4x16xf32>
    %cst_59 = arith.constant dense<0.000000e+00> : vector<16xf32>
    %286 = vector.multi_reduction <add>, %285, %cst_59 [0] : vector<4x16xf32> to vector<16xf32>
    %287 = vector.shape_cast %286 : vector<16xf32> to vector<1x16xf32>
    %cst_60 = arith.constant 4.000000e+00 : f32
    %288 = vector.broadcast %cst_60 : f32 to vector<1x16xf32>
    %289 = arith.divf %287, %288 : vector<1x16xf32>
    %290 = arith.mulf %284, %284 : vector<1x16xf32>
    %291 = arith.subf %289, %290 : vector<1x16xf32>
    %cst_61 = arith.constant 0.000000e+00 : f32
    %292 = vector.broadcast %cst_61 : f32 to vector<1x16xf32>
    %293 = arith.maximumf %291, %292 : vector<1x16xf32>
    %294 = vector.broadcast %284 : vector<1x16xf32> to vector<4x16xf32>
    %295 = arith.subf %280, %294 : vector<4x16xf32>
    %cst_62 = arith.constant 9.99999974E-6 : f32
    %296 = vector.broadcast %cst_62 : f32 to vector<1x16xf32>
    %297 = arith.addf %293, %296 : vector<1x16xf32>
    %298 = math.rsqrt %297 : vector<1x16xf32>
    %299 = vector.broadcast %298 : vector<1x16xf32> to vector<4x16xf32>
    %300 = arith.mulf %295, %299 : vector<4x16xf32>
    %301 = vector.extract_strided_slice %279 {offsets = [0, 0], sizes = [1, 16], strides = [1, 1]} : vector<2x16xf32> to vector<1x16xf32>
    %302 = vector.broadcast %301 : vector<1x16xf32> to vector<4x16xf32>
    %303 = arith.mulf %300, %302 : vector<4x16xf32>
    %304 = vector.extract_strided_slice %279 {offsets = [1, 0], sizes = [1, 16], strides = [1, 1]} : vector<2x16xf32> to vector<1x16xf32>
    %305 = vector.broadcast %304 : vector<1x16xf32> to vector<4x16xf32>
    %306 = arith.addf %303, %305 : vector<4x16xf32>
    %cst_63 = arith.constant 0.000000e+00 : f32
    %307 = vector.broadcast %cst_63 : f32 to vector<4x16xf32>
    %308 = arith.maximumf %306, %307 : vector<4x16xf32>
    %c176 = arith.constant 176 : index
    %c0_64 = arith.constant 0 : index
    %309 = vector.load %arg1[%c176, %c0_64] : memref<200x512xf32, #tpu.memory_space<vmem>>, vector<16x3xf32>
    %c192 = arith.constant 192 : index
    %c0_65 = arith.constant 0 : index
    %310 = vector.load %arg1[%c192, %c0_65] : memref<200x512xf32, #tpu.memory_space<vmem>>, vector<2x3xf32>
    %cst_66 = arith.constant dense<0.000000e+00> : vector<4x3xf32>
    %311 = tpu.matmul %308, %309, %cst_66 {dimension_numbers = #tpu.dot_dimension_numbers<[1], [0], [0], [1], [0, 0, 1, 1], [], []>} : vector<4x16xf32>, vector<16x3xf32>, vector<4x3xf32> -> vector<4x3xf32>
    %cst_67 = arith.constant dense<0.000000e+00> : vector<3xf32>
    %312 = vector.multi_reduction <add>, %311, %cst_67 [0] : vector<4x3xf32> to vector<3xf32>
    %313 = vector.shape_cast %312 : vector<3xf32> to vector<1x3xf32>
    %cst_68 = arith.constant 4.000000e+00 : f32
    %314 = vector.broadcast %cst_68 : f32 to vector<1x3xf32>
    %315 = arith.divf %313, %314 : vector<1x3xf32>
    %316 = arith.mulf %311, %311 : vector<4x3xf32>
    %cst_69 = arith.constant dense<0.000000e+00> : vector<3xf32>
    %317 = vector.multi_reduction <add>, %316, %cst_69 [0] : vector<4x3xf32> to vector<3xf32>
    %318 = vector.shape_cast %317 : vector<3xf32> to vector<1x3xf32>
    %cst_70 = arith.constant 4.000000e+00 : f32
    %319 = vector.broadcast %cst_70 : f32 to vector<1x3xf32>
    %320 = arith.divf %318, %319 : vector<1x3xf32>
    %321 = arith.mulf %315, %315 : vector<1x3xf32>
    %322 = arith.subf %320, %321 : vector<1x3xf32>
    %cst_71 = arith.constant 0.000000e+00 : f32
    %323 = vector.broadcast %cst_71 : f32 to vector<1x3xf32>
    %324 = arith.maximumf %322, %323 : vector<1x3xf32>
    %325 = vector.broadcast %315 : vector<1x3xf32> to vector<4x3xf32>
    %326 = arith.subf %311, %325 : vector<4x3xf32>
    %cst_72 = arith.constant 9.99999974E-6 : f32
    %327 = vector.broadcast %cst_72 : f32 to vector<1x3xf32>
    %328 = arith.addf %324, %327 : vector<1x3xf32>
    %329 = math.rsqrt %328 : vector<1x3xf32>
    %330 = vector.broadcast %329 : vector<1x3xf32> to vector<4x3xf32>
    %331 = arith.mulf %326, %330 : vector<4x3xf32>
    %332 = vector.extract_strided_slice %310 {offsets = [0, 0], sizes = [1, 3], strides = [1, 1]} : vector<2x3xf32> to vector<1x3xf32>
    %333 = vector.broadcast %332 : vector<1x3xf32> to vector<4x3xf32>
    %334 = arith.mulf %331, %333 : vector<4x3xf32>
    %335 = vector.extract_strided_slice %310 {offsets = [1, 0], sizes = [1, 3], strides = [1, 1]} : vector<2x3xf32> to vector<1x3xf32>
    %336 = vector.broadcast %335 : vector<1x3xf32> to vector<4x3xf32>
    %337 = arith.addf %334, %336 : vector<4x3xf32>
    %338 = math.tanh %337 : vector<4x3xf32>
    %cst_73 = arith.constant 2.000000e+00 : f32
    %339 = vector.broadcast %cst_73 : f32 to vector<4x3xf32>
    %340 = arith.mulf %338, %339 : vector<4x3xf32>
    %c0_74 = arith.constant 0 : index
    %c0_75 = arith.constant 0 : index
    %341 = vector.load %arg2[%c0_74, %c0_75] : memref<4x3xf32, #tpu.memory_space<vmem>>, vector<4x3xf32>
    tpu.vector_store %arg2[%c0_74, %c0_75], %340 {strides = array<i32>} : memref<4x3xf32, #tpu.memory_space<vmem>>, vector<4x3xf32>,
    return
  }
}

</mosaic_0001>

<bundles_post_ra>
// kernel: po_actor_forward.1
= control target key start
LH: loop header
LB: loop body
LE: loop exit
PB: predicated region body
PF: predicated region fallthrough
CT: control target
= control target key end

     0   :  { %7 = vsyncpa [#allocation3], 0  ;;  %s1233_s0 = inlined_call_operand.hbm [shape: f32[4,47], index: 0, kind: input, shape index: {}]   ;;  %s1234_s1 = inlined_call_operand.hbm [shape: f32[200,512], index: 1, kind: input, shape index: {}]   ;;  %s1235_s2 = inlined_call_operand.hbm [shape: f32[4,3], index: 2, kind: output, shape index: {}]  }
   0x1   :  { %8 = vsyncpa [#allocation6], 0 }
   0x2   :  { %9 = vsyncpa [#allocation4], 0  ;;  %s15_s11 = sshll.u32 %s1233_s0, 4  ;;  %s1109_s12 = smov [#allocation2]   ;;  %s16_s11 = int_to_ptr.hbm [resolvable:$true] %s15_s11 }
   0x3   :  { %s17_s13 = sshll.u32 %s1109_s12, 4  ;;  %s25_s16 = sshll.u32 %s1234_s1, 4  ;;  %s18_s13 = int_to_ptr.vmem [resolvable:$true] %s17_s13  ;;  %s26_s16 = int_to_ptr.hbm [resolvable:$true] %s25_s16 }
   0x4   :  { %20 = dma.hbm_to_vmem [thread:$0]  %s16_s11, 64, %s18_s13, [#allocation3]  }
   0x5   :  { %s1110_s17 = smov [#allocation5]   ;;  %s1111_s19 = smov 512  }
   0x6   :  { %s27_s18 = sshll.u32 %s1110_s17, 4  ;;  %s1112_s20 = smov 32   ;;  %s28_s18 = int_to_ptr.vmem [resolvable:$true] %s27_s18 }
   0x7   :  { %33 = dma.hbm_to_vmem [thread:$0]  %s26_s16, 12800, %s28_s18, [#allocation6], %s1111_s19, %s1111_s19, %s1112_s20  }
   0x8   :  { %1103 = dma.done.wait [#allocation3], 64  }
   0x9   :  { %1104 = vsyncadd [#allocation3], 4294967232 }
   0xa   :  { %1105 = dma.done.wait [#allocation6], 12800  }
   0xb   :  { %1106 = vsyncadd [#allocation6], 4294954496  ;;  %vm80_vm0 = vcmask 1046528   ;;  %v1146_v0 = vld [vmem:[#allocation2] sm:$0xf]  ;;  %s1113_s0 = smov 120  }
   0xc   :  { %v59_v1 = vld [vmem:[#allocation5 + $0xc0] sm:$0x7f]  ;;  %v60_v2 = vld [vmem:[#allocation5 + $0xc8] sm:$0x7f]  ;;  %75 = vrot.lane.b32.xlu0 %v1146_v0, %s1113_s0  ;;  %v61_v3 = vld [vmem:[#allocation5 + $0xd0] sm:$0x7f] }
   0xd   :  { %924 = vmatpush.msk.msra.mxu0 %vm80_vm0, %v59_v1  ;;  %v62_v4 = vld [vmem:[#allocation5 + $0xd8] sm:$0x7f]  ;;  %v55_v5 = vld [vmem:[#allocation5 + $0xa0] sm:$0xff]  ;;  %926 = vmatpush.msk.msra.mxu1 %vm80_vm0, %v60_v2  ;;  %v56_v6 = vld [vmem:[#allocation5 + $0xa8] sm:$0xff]  ;;  %vm77_vm1 = vcmask 318464   ;;  %v1114_v24 = vmov 0.0  }
   0xe   :  { %928 = vmatpush.msk.msra.mxu2 %vm80_vm0, %v61_v3  ;;  %v57_v7 = vld [vmem:[#allocation5 + $0xb0] sm:$0xff]  ;;  %v58_v8 = vld [vmem:[#allocation5 + $0xb8] sm:$0xff]  ;;  %930 = vmatpush.msk.msra.mxu3 %vm80_vm0, %v62_v4  ;;  %v51_v9 = vld [vmem:[#allocation5 + $0x80] sm:$0xff]  ;;  %s1115_s1 = smov 96   ;;  %s1116_s21 = smov 16   ;;  %vm175_vm6 = vcmask 130048  }
   0xf   :  { %105 = vmatpush.msra.mxu0 %v55_v5  ;;  %v52_v10 = vld [vmem:[#allocation5 + $0x88] sm:$0xff]  ;;  %v53_v11 = vld [vmem:[#allocation5 + $0x90] sm:$0xff]  ;;  %125 = vmatpush.msra.mxu1 %v56_v6  ;;  %v54_v12 = vld [vmem:[#allocation5 + $0x98] sm:$0xff]  ;;  %s1117_s22 = smov 64   ;;  %s1118_s23 = smov 80  }
  0x10   :  { %145 = vmatpush.msra.mxu2 %v57_v7  ;;  %v47_v13 = vld [vmem:[#allocation5 + $0x60] sm:$0xff]  ;;  %165 = vmatpush.msra.mxu3 %v58_v8  ;;  %v48_v14 = vld [vmem:[#allocation5 + $0x68] sm:$0xff]  ;;  %v49_v15 = vld [vmem:[#allocation5 + $0x70] sm:$0xff]  ;;  %s1119_s24 = smov 112   ;;  %s1120_s25 = smov 24  }
  0x11   :  { %106 = vmatpush.msra.mxu0 %v51_v9  ;;  %126 = vmatpush.msra.mxu1 %v52_v10  ;;  %v50_v16 = vld [vmem:[#allocation5 + $0x78] sm:$0xff]  ;;  %v43_v17 = vld [vmem:[#allocation5 + $0x40] sm:$0xff]  ;;  %v44_v18 = vld [vmem:[#allocation5 + $0x48] sm:$0xff]  ;;  %s1121_s26 = smov 104   ;;  %s1123_s27 = smov [#allocation7]  }
  0x12   :  { %146 = vmatpush.msra.mxu2 %v53_v11  ;;  %166 = vmatpush.msra.mxu3 %v54_v12  ;;  %v45_v19 = vld [vmem:[#allocation5 + $0x50] sm:$0xff]  ;;  %v46_v20 = vld [vmem:[#allocation5 + $0x58] sm:$0xff]  ;;  %v174_v21 = vld [vmem:[#allocation5 + $0x120] sm:$0xff]  ;;  %s911_s28 = sshll.u32 %s1123_s27, 4  ;;  %s913_s3 = sshll.u32 %s1235_s2, 4  ;;  %s912_s28 = int_to_ptr.vmem [resolvable:$true] %s911_s28  ;;  %s914_s3 = int_to_ptr.hbm [resolvable:$true] %s913_s3 }
  0x13   :  { %107 = vmatpush.msra.mxu0 %v47_v13  ;;  %127 = vmatpush.msra.mxu1 %v48_v14  ;;  %v173_v22 = vld [vmem:[#allocation5 + $0x100] sm:$0xff] }
  0x14   :  { %147 = vmatpush.msra.mxu2 %v49_v15  ;;  %167 = vmatpush.msra.mxu3 %v50_v16  ;;  %v1149_v25 = vld [vmem:[#allocation5 + $0xe0] ss:$8 sm:$0xf] }
  0x15   :  { %108 = vmatpush.msra.mxu0 %v43_v17  ;;  %128 = vmatpush.msra.mxu1 %v44_v18  ;;  %v66_v27 = vperm.slane %v1149_v25, 0 }
  0x16   :  { %148 = vmatpush.msra.mxu2 %v45_v19  ;;  %168 = vmatpush.msra.mxu3 %v46_v20  ;;  %v67_v20 = vperm.slane %v1149_v25, 1 }
  0x17   :  { %193 = vmatpush.msrb.mxu0 %v174_v21  ;;  %256 = vmatpush.msrb.mxu1 %v174_v21 }
  0x18   :  { %327 = vmatpush.msrb.mxu2 %v174_v21  ;;  %394 = vmatpush.msrb.mxu3 %v174_v21 }
  0x19   :  { %194 = vmatpush.msrb.mxu0 %v173_v22  ;;  %257 = vmatpush.msrb.mxu1 %v173_v22 }
  0x1a   :  { %328 = vmatpush.msrb.mxu2 %v173_v22  ;;  %395 = vmatpush.msrb.mxu3 %v173_v22 }
  0x7e   :  { %v76_v23 = vpop.permute.xlu0 %75 }
  0x7f   :  { %925 = vmatmul.msk.f32.vlgmr.msra.gmra.mxu0 %vm77_vm1, %v76_v23  ;;  %927 = vmatmul.msk.f32.vlgmr.msra.gmra.mxu1 %vm77_vm1, %v76_v23 }
  0x80   :  { %929 = vmatmul.msk.f32.vlgmr.msra.gmra.mxu2 %vm77_vm1, %v76_v23  ;;  %931 = vmatmul.msk.f32.vlgmr.msra.gmra.mxu3 %vm77_vm1, %v76_v23 }
  0x81   :  { %465 = vmatpush.msra.mxu0 %v174_v21  ;;  %532 = vmatpush.msra.mxu1 %v174_v21 }
  0x83   :  { %466 = vmatpush.msra.mxu0 %v173_v22  ;;  %533 = vmatpush.msra.mxu1 %v173_v22 }
  0x87   :  { %195 = vmatmul.f32.vlgmr.msrb.gmra.mxu0 %v1114_v24 }
  0xfc   :  { %v110_v26 = vpop.f32.mrf.mxu0  ;;  %v130_v54 = vpop.f32.mrf.mxu1 }
  0xfd   :  { %v111_v28 = vadd.f32 %v110_v26, %v66_v27  ;;  %v131_v21 = vadd.f32 %v130_v54, %v67_v20 }
 0x103   :  { %v1165_v19 = vpop.f32.mrf.mxu2 }
 0x104   :  { %v196_v29 = vpop.f32.mrf.mxu0 }
 0x105   :  { %v199_v30 = vadd.f32 %v196_v29, %v111_v28 }
 0x107   :  { %963 = vtanh.f32 %v199_v30  ;;  %v932_v32 = vmul.f32 -1.442695, %v199_v30 }
 0x109   :  { %965 = vpow2.f32 %v932_v32 }
 0x10d   :  { %v964_v31 = vpop.eup %963 }
 0x10e   :  { %222 = vrot.lane.b32.xlu0 %v964_v31, %s1115_s1 }
 0x10f   :  { %v966_v33 = vpop.eup %965 }
 0x110   :  { %v203_v34 = vadd.f32 1.0, %v966_v33 }
 0x112   :  { %967 = vrcp.f32 %v203_v34  ;;  %v215_v40 = vand.u32 2147483648, %v203_v34  ;;  %vm209_vm3 = vweird.f32 %v203_v34  ;;  %v213_v41 = vand.u32 2147483647, %v203_v34 }
 0x114   :  { %v216_v43 = vor.u32 1.1754944e-38, %v215_v40  ;;  %vm214_vm5 = vcmp.eq.f32.partialorder %v213_v41, 8.507059e+37 }
 0x118   :  { %v968_v35 = vpop.eup %967 }
 0x119   :  { %v205_v36 = vmul.f32 %v968_v35, %v203_v34  ;;  %vm210_vm2 = vweird.f32 %v968_v35 }
 0x11a   :  { %vm211_vm4 = vmor %vm209_vm3, %vm210_vm2 }
 0x11b   :  { %v206_v37 = vsub.f32 1.0, %v205_v36 }
 0x11d   :  { %v207_v38 = vmul.f32 %v968_v35, %v206_v37 }
 0x11f   :  { %v208_v39 = vadd.f32 %v968_v35, %v207_v38 }
 0x121   :  { %v212_v42 = vsel %vm211_vm4, %v968_v35, %v208_v39 }
 0x122   :  { %v217_v45 = vsel %vm214_vm5, %v216_v43, %v212_v42 }
 0x123   :  { %v220_v47 = vmul.f32 0.0, %v217_v45 }
 0x180   :  { %v223_v44 = vpop.permute.xlu0 %222 }
 0x181   :  { %v225_v46 = vmul.f32 %v223_v44, %v217_v45 }
 0x183   :  { %227 = vrot.lane.b32.xlu1 %v225_v46, %s1116_s21 }
 0x1f5   :  { %v228_v48 = vpop.permute.xlu1 %227 }
 0x1f6   :  { %v230_v49 = vadd.f32 %v228_v48, %v220_v47 }
 0x1f8   :  { %969 = vtanh.f32 %v230_v49 }
 0x1fe   :  { %v970_v50 = vpop.eup %969 }
 0x1ff   :  { %233 = vrot.lane.b32.xlu1 %v970_v50, %s1112_s20 }
 0x207   :  { %288 = vrot.lane.b32.xlu1 %v230_v49, %s1117_s22  ;;  %v1174_v49 = vpop.f32.mrf.mxu3 }
 0x271   :  { %v234_v51 = vpop.permute.xlu1 %233 }
 0x272   :  { %v236_v52 = vmul.f32 %v234_v51, %v217_v45 }
 0x274   :  { %238 = vrot.lane.b32.xlu2 %v236_v52, %s1118_s23 }
 0x279   :  { %v289_v11 = vpop.permute.xlu1 %288 }
 0x2ce   :  { %v239_v53 = vpop.permute.xlu2 %238 }
 0x2cf   :  { %933 = vmatmul.msk.f32.vlgmr.msrb.gmra.mxu1 %vm175_vm6, %v239_v53 }
 0x34c   :  { %v259_v55 = vpop.f32.mrf.mxu1 }
 0x34d   :  { %263 = vrot.lane.b32.xlu2 %v259_v55, %s1117_s22 }
 0x3a7   :  { %v264_v56 = vpop.permute.xlu2 %263 }
 0x3a8   :  { %v266_v57 = vadd.f32 %v264_v56, %v111_v28 }
 0x3aa   :  { %971 = vtanh.f32 %v266_v57  ;;  %v934_v59 = vmul.f32 -1.442695, %v266_v57 }
 0x3ac   :  { %973 = vpow2.f32 %v934_v59 }
 0x3b0   :  { %v972_v58 = vpop.eup %971 }
 0x3b1   :  { %293 = vrot.lane.b32.xlu0 %v972_v58, %s1115_s1 }
 0x3b2   :  { %v974_v60 = vpop.eup %973 }
 0x3b3   :  { %v270_v61 = vadd.f32 1.0, %v974_v60 }
 0x3b5   :  { %975 = vrcp.f32 %v270_v61  ;;  %v282_v4 = vand.u32 2147483648, %v270_v61  ;;  %vm276_vm8 = vweird.f32 %v270_v61  ;;  %v280_v5 = vand.u32 2147483647, %v270_v61 }
 0x3b7   :  { %v283_v7 = vor.u32 1.1754944e-38, %v282_v4  ;;  %vm281_vm10 = vcmp.eq.f32.partialorder %v280_v5, 8.507059e+37 }
 0x3bb   :  { %v976_v62 = vpop.eup %975 }
 0x3bc   :  { %v272_v63 = vmul.f32 %v976_v62, %v270_v61  ;;  %vm277_vm7 = vweird.f32 %v976_v62 }
 0x3bd   :  { %vm278_vm9 = vmor %vm276_vm8, %vm277_vm7  ;;  %vm617_vm8 = vcmask 64512  }
 0x3be   :  { %v273_v1 = vsub.f32 1.0, %v272_v63 }
 0x3c0   :  { %v274_v2 = vmul.f32 %v976_v62, %v273_v1 }
 0x3c2   :  { %v275_v3 = vadd.f32 %v976_v62, %v274_v2 }
 0x3c4   :  { %v279_v6 = vsel %vm278_vm9, %v976_v62, %v275_v3 }
 0x3c5   :  { %v284_v9 = vsel %vm281_vm10, %v283_v7, %v279_v6 }
 0x3c6   :  { %v291_v12 = vmul.f32 %v289_v11, %v284_v9 }
 0x423   :  { %v294_v8 = vpop.permute.xlu0 %293 }
 0x424   :  { %v296_v10 = vmul.f32 %v294_v8, %v284_v9 }
 0x426   :  { %298 = vrot.lane.b32.xlu2 %v296_v10, %s1116_s21 }
 0x480   :  { %v299_v13 = vpop.permute.xlu2 %298 }
 0x481   :  { %v301_v14 = vadd.f32 %v299_v13, %v291_v12 }
 0x483   :  { %977 = vtanh.f32 %v301_v14 }
 0x489   :  { %v978_v15 = vpop.eup %977 }
 0x48a   :  { %304 = vrot.lane.b32.xlu0 %v978_v15, %s1112_s20 }
 0x492   :  { %355 = vrot.lane.b32.xlu0 %v301_v14, %s1117_s22  ;;  %v68_v14 = vperm.slane %v1149_v25, 2 }
 0x494   :  { %v151_v15 = vadd.f32 %v1165_v19, %v68_v14 }
 0x4fc   :  { %v305_v16 = vpop.permute.xlu0 %304 }
 0x4fd   :  { %v307_v17 = vmul.f32 %v305_v16, %v284_v9 }
 0x4ff   :  { %309 = vrot.lane.b32.xlu1 %v307_v17, %s1116_s21 }
 0x504   :  { %v356_v41 = vpop.permute.xlu0 %355 }
 0x571   :  { %v310_v18 = vpop.permute.xlu1 %309 }
 0x572   :  { %935 = vmatmul.msk.f32.vlgmr.msrb.gmra.mxu2 %vm175_vm6, %v310_v18 }
 0x5f5   :  { %v330_v22 = vpop.f32.mrf.mxu2 }
 0x5f6   :  { %v333_v23 = vadd.f32 %v330_v22, %v131_v21 }
 0x5f8   :  { %979 = vtanh.f32 %v333_v23  ;;  %v936_v26 = vmul.f32 -1.442695, %v333_v23 }
 0x5fa   :  { %981 = vpow2.f32 %v936_v26 }
 0x5fe   :  { %v980_v24 = vpop.eup %979 }
 0x5ff   :  { %360 = vrot.lane.b32.xlu2 %v980_v24, %s1115_s1 }
 0x600   :  { %v982_v27 = vpop.eup %981 }
 0x601   :  { %v337_v28 = vadd.f32 1.0, %v982_v27 }
 0x603   :  { %983 = vrcp.f32 %v337_v28  ;;  %v349_v34 = vand.u32 2147483648, %v337_v28  ;;  %vm343_vm12 = vweird.f32 %v337_v28  ;;  %v347_v35 = vand.u32 2147483647, %v337_v28 }
 0x605   :  { %v350_v37 = vor.u32 1.1754944e-38, %v349_v34  ;;  %vm348_vm14 = vcmp.eq.f32.partialorder %v347_v35, 8.507059e+37 }
 0x609   :  { %v984_v29 = vpop.eup %983 }
 0x60a   :  { %v339_v30 = vmul.f32 %v984_v29, %v337_v28  ;;  %vm344_vm11 = vweird.f32 %v984_v29 }
 0x60b   :  { %vm345_vm13 = vmor %vm343_vm12, %vm344_vm11 }
 0x60c   :  { %v340_v31 = vsub.f32 1.0, %v339_v30 }
 0x60e   :  { %v341_v32 = vmul.f32 %v984_v29, %v340_v31 }
 0x610   :  { %v342_v33 = vadd.f32 %v984_v29, %v341_v32 }
 0x612   :  { %v346_v36 = vsel %vm345_vm13, %v984_v29, %v342_v33 }
 0x613   :  { %v351_v39 = vsel %vm348_vm14, %v350_v37, %v346_v36 }
 0x614   :  { %v358_v42 = vmul.f32 %v356_v41, %v351_v39 }
 0x659   :  { %v361_v38 = vpop.permute.xlu2 %360 }
 0x65a   :  { %v363_v40 = vmul.f32 %v361_v38, %v351_v39 }
 0x65c   :  { %365 = vrot.lane.b32.xlu1 %v363_v40, %s1116_s21 }
 0x6ce   :  { %v366_v43 = vpop.permute.xlu1 %365 }
 0x6cf   :  { %v368_v44 = vadd.f32 %v366_v43, %v358_v42 }
 0x6d1   :  { %985 = vtanh.f32 %v368_v44 }
 0x6d7   :  { %v986_v45 = vpop.eup %985 }
 0x6d8   :  { %371 = vrot.lane.b32.xlu2 %v986_v45, %s1112_s20 }
 0x732   :  { %v372_v46 = vpop.permute.xlu2 %371 }
 0x733   :  { %v374_v47 = vmul.f32 %v372_v46, %v351_v39  ;;  %v69_v46 = vperm.slane %v1149_v25, 3 }
 0x735   :  { %376 = vrot.lane.b32.xlu0 %v374_v47, %s1118_s23  ;;  %v171_v47 = vadd.f32 %v1174_v49, %v69_v46 }
 0x73d   :  { %426 = vrot.lane.b32.xlu0 %v368_v44, %s1117_s22 }
 0x7a7   :  { %v377_v48 = vpop.permute.xlu0 %376 }
 0x7a8   :  { %937 = vmatmul.msk.f32.vlgmr.msrb.gmra.mxu3 %vm175_vm6, %v377_v48 }
 0x7af   :  { %v427_v6 = vpop.permute.xlu0 %426 }
 0x82b   :  { %v397_v50 = vpop.f32.mrf.mxu3 }
 0x82c   :  { %401 = vrot.lane.b32.xlu1 %v397_v50, %s1117_s22 }
 0x89e   :  { %v402_v51 = vpop.permute.xlu1 %401 }
 0x89f   :  { %v404_v52 = vadd.f32 %v402_v51, %v131_v21 }
 0x8a1   :  { %987 = vtanh.f32 %v404_v52  ;;  %v938_v54 = vmul.f32 -1.442695, %v404_v52  ;;  %v943_v52 = vmul.f32 -1.442695, %v171_v47 }
 0x8a3   :  { %989 = vpow2.f32 %v938_v54 }
 0x8a7   :  { %v988_v53 = vpop.eup %987 }
 0x8a8   :  { %431 = vrot.lane.b32.xlu2 %v988_v53, %s1115_s1 }
 0x8a9   :  { %v990_v55 = vpop.eup %989 }
 0x8aa   :  { %v408_v56 = vadd.f32 1.0, %v990_v55 }
 0x8ac   :  { %991 = vrcp.f32 %v408_v56  ;;  %v420_v62 = vand.u32 2147483648, %v408_v56  ;;  %vm414_vm0 = vweird.f32 %v408_v56  ;;  %v418_v63 = vand.u32 2147483647, %v408_v56 }
 0x8ae   :  { %v421_v2 = vor.u32 1.1754944e-38, %v420_v62  ;;  %vm419_vm2 = vcmp.eq.f32.partialorder %v418_v63, 8.507059e+37 }
 0x8b2   :  { %v992_v57 = vpop.eup %991 }
 0x8b3   :  { %v410_v58 = vmul.f32 %v992_v57, %v408_v56  ;;  %vm415_vm15 = vweird.f32 %v992_v57 }
 0x8b4   :  { %vm416_vm1 = vmor %vm414_vm0, %vm415_vm15 }
 0x8b5   :  { %v411_v59 = vsub.f32 1.0, %v410_v58 }
 0x8b7   :  { %v412_v60 = vmul.f32 %v992_v57, %v411_v59  ;;  %v615_v59 = vld [vmem:[#allocation5] sm:$0xff] }
 0x8b8   :  { %635 = vmatpush.msra.mxu2 %v615_v59 }
 0x8b9   :  { %v413_v61 = vadd.f32 %v992_v57, %v412_v60  ;;  %944 = vmatmul.msk.f32.vlgmr.msra.gmra.mxu2 %vm617_vm8, %v1146_v0  ;;  %vm699_vm8 = vcmask 261120  }
 0x8bb   :  { %v417_v1 = vsel %vm416_vm1, %v992_v57, %v413_v61  ;;  %vm640_vm1 = vcmask 125952  }
 0x8bc   :  { %v422_v4 = vsel %vm419_vm2, %v421_v2, %v417_v1 }
 0x8bd   :  { %v429_v7 = vmul.f32 %v427_v6, %v422_v4 }
 0x902   :  { %v432_v3 = vpop.permute.xlu2 %431 }
 0x903   :  { %v434_v5 = vmul.f32 %v432_v3, %v422_v4 }
 0x905   :  { %436 = vrot.lane.b32.xlu1 %v434_v5, %s1116_s21 }
 0x977   :  { %v437_v8 = vpop.permute.xlu1 %436 }
 0x978   :  { %v439_v9 = vadd.f32 %v437_v8, %v429_v7 }
 0x97a   :  { %993 = vtanh.f32 %v439_v9 }
 0x980   :  { %v994_v10 = vpop.eup %993 }
 0x981   :  { %442 = vrot.lane.b32.xlu2 %v994_v10, %s1112_s20 }
 0x989   :  { %493 = vrot.lane.b32.xlu2 %v439_v9, %s1117_s22 }
 0x9db   :  { %v443_v11 = vpop.permute.xlu2 %442 }
 0x9dc   :  { %v445_v12 = vmul.f32 %v443_v11, %v422_v4 }
 0x9de   :  { %447 = vrot.lane.b32.xlu0 %v445_v12, %s1116_s21 }
 0x9e3   :  { %v494_v35 = vpop.permute.xlu2 %493 }
 0xa50   :  { %v448_v13 = vpop.permute.xlu0 %447 }
 0xa51   :  { %939 = vmatmul.msk.f32.vlgmr.msra.gmra.mxu0 %vm175_vm6, %v448_v13 }
 0xace   :  { %v468_v16 = vpop.f32.mrf.mxu0 }
 0xacf   :  { %v471_v17 = vadd.f32 %v468_v16, %v151_v15 }
 0xad1   :  { %995 = vtanh.f32 %v471_v17  ;;  %v940_v20 = vmul.f32 -1.442695, %v471_v17 }
 0xad3   :  { %997 = vpow2.f32 %v940_v20 }
 0xad7   :  { %v996_v18 = vpop.eup %995 }
 0xad8   :  { %498 = vrot.lane.b32.xlu1 %v996_v18, %s1115_s1 }
 0xad9   :  { %v998_v21 = vpop.eup %997 }
 0xada   :  { %v475_v22 = vadd.f32 1.0, %v998_v21 }
 0xadc   :  { %999 = vrcp.f32 %v475_v22  ;;  %v487_v29 = vand.u32 2147483648, %v475_v22  ;;  %vm481_vm4 = vweird.f32 %v475_v22  ;;  %v485_v19 = vand.u32 2147483647, %v475_v22 }
 0xade   :  { %v488_v31 = vor.u32 1.1754944e-38, %v487_v29  ;;  %vm486_vm7 = vcmp.eq.f32.partialorder %v485_v19, 8.507059e+37  ;;  %v706_v19 = vld [vmem:[#allocation5 + $0x1a0] sm:$0xff] }
 0xae2   :  { %v1000_v23 = vpop.eup %999 }
 0xae3   :  { %v477_v24 = vmul.f32 %v1000_v23, %v475_v22  ;;  %vm482_vm3 = vweird.f32 %v1000_v23 }
 0xae4   :  { %vm483_vm5 = vmor %vm481_vm4, %vm482_vm3 }
 0xae5   :  { %v478_v26 = vsub.f32 1.0, %v477_v24 }
 0xae7   :  { %v479_v27 = vmul.f32 %v1000_v23, %v478_v26 }
 0xae9   :  { %v480_v28 = vadd.f32 %v1000_v23, %v479_v27  ;;  %v708_v27 = vld [vmem:[#allocation5 + $0x1e0] sm:$0xff] }
 0xaea   :  { %724 = vmatpush.msra.mxu3 %v708_v27 }
 0xaeb   :  { %v484_v30 = vsel %vm483_vm5, %v1000_v23, %v480_v28  ;;  %v707_v28 = vld [vmem:[#allocation5 + $0x1c0] sm:$0xff] }
 0xaec   :  { %v489_v33 = vsel %vm486_vm7, %v488_v31, %v484_v30  ;;  %725 = vmatpush.msra.mxu3 %v707_v28  ;;  %v705_v30 = vld [vmem:[#allocation5 + $0x180] sm:$0xff]  ;;  %v637_v31 = vpop.f32.mrf.mxu2  ;;  %vm697_vm7 = vcmask 195584  }
 0xaed   :  { %v496_v36 = vmul.f32 %v494_v35, %v489_v33 }
 0xaee   :  { %726 = vmatpush.msra.mxu3 %v706_v19 }
 0xaf0   :  { %727 = vmatpush.msra.mxu3 %v705_v30 }
 0xb4a   :  { %v499_v32 = vpop.permute.xlu1 %498 }
 0xb4b   :  { %v501_v34 = vmul.f32 %v499_v32, %v489_v33  ;;  %v1122_v32 = vmov 4.0  }
 0xb4d   :  { %503 = vrot.lane.b32.xlu0 %v501_v34, %s1116_s21  ;;  %v656_v34 = vmul.f32 %v637_v31, %v637_v31 }
 0xbbf   :  { %v504_v37 = vpop.permute.xlu0 %503 }
 0xbc0   :  { %v506_v38 = vadd.f32 %v504_v37, %v496_v36  ;;  %v657_v36 = vsel %vm640_vm1, %v656_v34, 0.0 }
 0xbc2   :  { %1001 = vtanh.f32 %v506_v38 }
 0xbc8   :  { %v1002_v39 = vpop.eup %1001 }
 0xbc9   :  { %509 = vrot.lane.b32.xlu1 %v1002_v39, %s1112_s20  ;;  %v658_v39 = vrot.slane %v657_v36, 4 }
 0xc3b   :  { %v510_v40 = vpop.permute.xlu1 %509 }
 0xc3c   :  { %v1188_v41 = vmul.f32 %v510_v40, %v489_v33  ;;  %v641_v33 = vsel %vm640_vm1, %v637_v31, 0.0 }
 0xc3d   :  { %v642_v35 = vrot.slane %v641_v33, 4 }
 0xc3e   :  { %514 = vrot.lane.b32.xlu2 %v1188_v41, %s1118_s23 }
 0xc46   :  { %564 = vrot.lane.b32.xlu2 %v506_v38, %s1117_s22  ;;  %v643_v38 = vadd.f32 %v642_v35, %v641_v33  ;;  %v775_v35 = vld [vmem:[#allocation5 + $0x260] sm:$0xff] }
 0xc98   :  { %v515_v42 = vpop.permute.xlu2 %514 }
 0xc99   :  { %941 = vmatmul.msk.f32.vlgmr.msra.gmra.mxu1 %vm175_vm6, %v515_v42  ;;  %v659_v42 = vadd.f32 %v658_v39, %v657_v36 }
 0xca0   :  { %v565_v17 = vpop.permute.xlu2 %564 }
 0xd16   :  { %v535_v43 = vpop.f32.mrf.mxu1 }
 0xd17   :  { %539 = vrot.lane.b32.xlu0 %v535_v43, %s1117_s22 }
 0xd89   :  { %v540_v44 = vpop.permute.xlu0 %539 }
 0xd8a   :  { %v542_v45 = vadd.f32 %v540_v44, %v151_v15 }
 0xd8c   :  { %1003 = vtanh.f32 %v542_v45  ;;  %v942_v51 = vmul.f32 -1.442695, %v542_v45  ;;  %v660_v45 = vrot.slane %v659_v42, 2 }
 0xd8d   :  { %1005 = vtanh.f32 %v171_v47 }
 0xd8e   :  { %1007 = vpow2.f32 %v942_v51 }
 0xd8f   :  { %1009 = vpow2.f32 %v943_v52 }
 0xd92   :  { %v1004_v48 = vpop.eup %1003 }
 0xd93   :  { %569 = vrot.lane.b32.xlu1 %v1004_v48, %s1115_s1  ;;  %v1006_v50 = vpop.eup %1005  ;;  %v661_v48 = vadd.f32 %v660_v45, %v659_v42 }
 0xd94   :  { %v1008_v53 = vpop.eup %1007 }
 0xd95   :  { %v546_v54 = vadd.f32 1.0, %v1008_v53  ;;  %v1010_v55 = vpop.eup %1009  ;;  %v662_v52 = vrot.slane %v661_v48, 1 }
 0xd96   :  { %v587_v25 = vadd.f32 1.0, %v1010_v55 }
 0xd97   :  { %1011 = vrcp.f32 %v546_v54  ;;  %v558_v1 = vand.u32 2147483648, %v546_v54  ;;  %vm552_vm10 = vweird.f32 %v546_v54  ;;  %v556_v2 = vand.u32 2147483647, %v546_v54 }
 0xd98   :  { %1013 = vrcp.f32 %v587_v25  ;;  %v599_v10 = vand.u32 2147483648, %v587_v25  ;;  %vm593_vm14 = vweird.f32 %v587_v25  ;;  %v597_v0 = vand.u32 2147483647, %v587_v25 }
 0xd99   :  { %v559_v5 = vor.u32 1.1754944e-38, %v558_v1  ;;  %vm557_vm12 = vcmp.eq.f32.partialorder %v556_v2, 8.507059e+37  ;;  %v663_v55 = vadd.f32 %v662_v52, %v661_v48 }
 0xd9a   :  { %v600_v12 = vor.u32 1.1754944e-38, %v599_v10  ;;  %vm598_vm0 = vcmp.eq.f32.partialorder %v597_v0, 8.507059e+37 }
 0xd9b   :  { %605 = vrot.lane.b32.xlu1 %v1006_v50, %s1119_s24 }
 0xd9d   :  { %v1012_v56 = vpop.eup %1011 }
 0xd9e   :  { %v548_v49 = vmul.f32 %v1012_v56, %v546_v54  ;;  %v1014_v58 = vpop.eup %1013  ;;  %vm553_vm9 = vweird.f32 %v1012_v56 }
 0xd9f   :  { %v589_v61 = vmul.f32 %v1014_v58, %v587_v25  ;;  %vm554_vm11 = vmor %vm552_vm10, %vm553_vm9  ;;  %vm594_vm13 = vweird.f32 %v1014_v58  ;;  %vm701_vm9 = vcmask 326656   ;;  %vm710_vm10 = vcmask 392192  }
 0xda0   :  { %v549_v57 = vsub.f32 1.0, %v548_v49  ;;  %vm595_vm15 = vmor %vm593_vm14, %vm594_vm13 }
 0xda1   :  { %v590_v63 = vsub.f32 1.0, %v589_v61  ;;  %v704_v61 = vld [vmem:[#allocation5 + $0x160] sm:$0xff] }
 0xda2   :  { %v550_v60 = vmul.f32 %v1012_v56, %v549_v57  ;;  %728 = vmatpush.msra.mxu3 %v704_v61 }
 0xda3   :  { %v591_v4 = vmul.f32 %v1014_v58, %v590_v63 }
 0xda4   :  { %v551_v62 = vadd.f32 %v1012_v56, %v550_v60 }
 0xda5   :  { %v592_v9 = vadd.f32 %v1014_v58, %v591_v4 }
 0xda6   :  { %v555_v3 = vsel %vm554_vm11, %v1012_v56, %v551_v62  ;;  %v703_v62 = vld [vmem:[#allocation5 + $0x140] sm:$0xff]  ;;  %vm734_vm11 = vcmask 257024  }
 0xda7   :  { %v560_v7 = vsel %vm557_vm12, %v559_v5, %v555_v3  ;;  %v596_v11 = vsel %vm595_vm15, %v1014_v58, %v592_v9  ;;  %729 = vmatpush.msra.mxu3 %v703_v62  ;;  %v616_v5 = vld [vmem:[#allocation5 + $0x20] sm:$0x3] }
 0xda8   :  { %v601_v13 = vsel %vm598_vm0, %v600_v12, %v596_v11  ;;  %v567_v18 = vmul.f32 %v565_v17, %v560_v7  ;;  %v683_v10 = vperm.slane %v616_v5, 1 }
 0xe05   :  { %v570_v6 = vpop.permute.xlu1 %569 }
 0xe06   :  { %v572_v8 = vmul.f32 %v570_v6, %v560_v7 }
 0xe08   :  { %574 = vrot.lane.b32.xlu0 %v572_v8, %s1116_s21  ;;  %v681_v8 = vperm.slane %v616_v5, 0 }
 0xe0d   :  { %v606_v14 = vpop.permute.xlu1 %605 }
 0xe0e   :  { %v608_v15 = vmul.f32 %v606_v14, %v601_v13 }
 0xe10   :  { %1015 = vtanh.f32 %v608_v15 }
 0xe16   :  { %v1016_v16 = vpop.eup %1015 }
 0xe17   :  { %611 = vrot.lane.b32.xlu0 %v1016_v16, %s1120_s25 }
 0xe7a   :  { %v575_v20 = vpop.permute.xlu0 %574 }
 0xe7b   :  { %v577_v21 = vadd.f32 %v575_v20, %v567_v18 }
 0xe7d   :  { %1017 = vtanh.f32 %v577_v21 }
 0xe7e   :  { %1019 = vrcp.f32 %v1122_v32  ;;  %v776_v32 = vld [vmem:[#allocation5 + $0x280] sm:$0xff] }
 0xe7f   :  { %793 = vmatpush.msrb.mxu0 %v776_v32 }
 0xe81   :  { %794 = vmatpush.msrb.mxu0 %v775_v35 }
 0xe83   :  { %v1018_v22 = vpop.eup %1017 }
 0xe84   :  { %580 = vrot.lane.b32.xlu2 %v1018_v22, %s1112_s20  ;;  %v1020_v37 = vpop.eup %1019 }
 0xe85   :  { %v649_v40 = vmul.f32 4.0, %v1020_v37  ;;  %vm653_vm2 = vweird.f32 %v1020_v37 }
 0xe87   :  { %v650_v43 = vsub.f32 1.0, %v649_v40 }
 0xe89   :  { %v612_v23 = vpop.permute.xlu0 %611  ;;  %v651_v46 = vmul.f32 %v1020_v37, %v650_v43 }
 0xe8a   :  { %v1202_v24 = vmul.f32 %v612_v23, %v601_v13 }
 0xe8b   :  { %v652_v50 = vadd.f32 %v1020_v37, %v651_v46 }
 0xe8c   :  { %693 = vrot.lane.b32.xlu0 %v1202_v24, %s1119_s24  ;;  %689 = vrot.lane.b32.xlu2 %v1188_v41, %s1121_s26  ;;  %v644_v41 = vrot.slane %v643_v38, 2 }
 0xe8d   :  { %v1210_v53 = vsel %vm653_vm2, %v1020_v37, %v652_v50  ;;  %v709_v50 = vld [vmem:[#allocation5 + $0x200] sm:$0x3]  ;;  %vm865_vm2 = vcmask 19456  }
 0xe8e   :  { %v645_v44 = vadd.f32 %v644_v41, %v643_v38  ;;  %v664_v25 = vmul.f32 %v663_v55, %v1210_v53  ;;  %v774_v38 = vld [vmem:[#allocation5 + $0x240] sm:$0xff]  ;;  %v768_v55 = vperm.slane %v709_v50, 0 }
 0xe8f   :  { %795 = vmatpush.msrb.mxu0 %v774_v38  ;;  %v773_v41 = vld [vmem:[#allocation5 + $0x220] sm:$0xff] }
 0xe90   :  { %v646_v47 = vrot.slane %v645_v44, 1 }
 0xe91   :  { %796 = vmatpush.msrb.mxu0 %v773_v41 }
 0xe92   :  { %v647_v51 = vadd.f32 %v646_v47, %v645_v44 }
 0xe94   :  { %v655_v54 = vmul.f32 %v1210_v53, %v647_v51 }
 0xe96   :  { %v665_v56 = vmul.f32 %v655_v54, %v655_v54  ;;  %v668_v4 = vsub.f32 %v637_v31, %v655_v54 }
 0xe98   :  { %v666_v49 = vsub.f32 %v664_v25, %v665_v56 }
 0xe9a   :  { %v667_v57 = vmax.f32 %v666_v49, 0.0  ;;  %v770_v49 = vperm.slane %v709_v50, 1 }
 0xe9c   :  { %v669_v58 = vadd.f32 1e-05, %v667_v57 }
 0xe9e   :  { %1021 = vrsqrt.f32 %v669_v58  ;;  %vm676_vm3 = vweird.f32 %v669_v58 }
 0xea4   :  { %v1022_v59 = vpop.eup %1021 }
 0xea5   :  { %v671_v60 = vmul.f32 %v1022_v59, %v669_v58  ;;  %vm677_vm4 = vweird.f32 %v1022_v59 }
 0xea6   :  { %vm678_vm5 = vmor %vm676_vm3, %vm677_vm4 }
 0xea7   :  { %v672_v63 = vmul.f32 %v1022_v59, %v671_v60 }
 0xea9   :  { %v673_v1 = vmul.f32 0.5, %v672_v63 }
 0xeab   :  { %v674_v2 = vsub.f32 1.5, %v673_v1 }
 0xead   :  { %v675_v3 = vmul.f32 %v1022_v59, %v674_v2 }
 0xeaf   :  { %v679_v6 = vsel %vm678_vm5, %v1022_v59, %v675_v3 }
 0xede   :  { %v581_v26 = vpop.permute.xlu2 %580 }
 0xedf   :  { %v583_v29 = vmul.f32 %v581_v26, %v560_v7  ;;  %v680_v7 = vmul.f32 %v679_v6, %v668_v4 }
 0xee1   :  { %686 = vrot.lane.b32.xlu1 %v583_v29, %s1112_s20  ;;  %v682_v9 = vmul.f32 %v681_v8, %v680_v7 }
 0xee3   :  { %v684_v0 = vadd.f32 %v683_v10, %v682_v9 }
 0xee6   :  { %v690_v13 = vpop.permute.xlu2 %689 }
 0xefe   :  { %v694_v15 = vpop.permute.xlu0 %693 }
 0xf53   :  { %v687_v11 = vpop.permute.xlu1 %686 }
 0xf54   :  { %v696_v12 = vsel %vm175_vm6, %v684_v0, %v687_v11 }
 0xf55   :  { %v698_v14 = vsel %vm697_vm7, %v696_v12, %v1202_v24 }
 0xf56   :  { %v700_v16 = vsel %vm699_vm8, %v698_v14, %v690_v13  ;;  %v840_v13 = vld [vmem:[#allocation5 + $0x2e0] sm:$0xff] }
 0xf57   :  { %v702_v17 = vsel %vm701_vm9, %v700_v16, %v694_v15  ;;  %859 = vmatpush.msrb.mxu1 %v840_v13  ;;  %v839_v16 = vld [vmem:[#allocation5 + $0x2c0] sm:$0xff] }
 0xf58   :  { %945 = vmatmul.msk.f32.vlgmr.msra.gmra.mxu3 %vm710_vm10, %v702_v17 }
 0xf59   :  { %860 = vmatpush.msrb.mxu1 %v839_v16 }
 0xfdb   :  { %v731_v18 = vpop.f32.mrf.mxu3 }
 0xfdc   :  { %v735_v20 = vsel %vm734_vm11, %v731_v18, 0.0  ;;  %v743_v21 = vmul.f32 %v731_v18, %v731_v18 }
 0xfdd   :  { %v736_v22 = vrot.slane %v735_v20, 4 }
 0xfde   :  { %v744_v23 = vsel %vm734_vm11, %v743_v21, 0.0 }
 0xfdf   :  { %v737_v26 = vadd.f32 %v736_v22, %v735_v20  ;;  %v745_v27 = vrot.slane %v744_v23, 4 }
 0xfe1   :  { %v738_v28 = vrot.slane %v737_v26, 2  ;;  %v746_v29 = vadd.f32 %v745_v27, %v744_v23  ;;  %v777_v27 = vld [vmem:[#allocation5 + $0x2a0] sm:$0x3] }
 0xfe2   :  { %v836_v32 = vperm.slane %v777_v27, 1 }
 0xfe3   :  { %v739_v19 = vadd.f32 %v738_v28, %v737_v26  ;;  %v747_v30 = vrot.slane %v746_v29, 2 }
 0xfe5   :  { %v740_v31 = vrot.slane %v739_v19, 1  ;;  %v748_v24 = vadd.f32 %v747_v30, %v746_v29  ;;  %v834_v30 = vperm.slane %v777_v27, 0 }
 0xfe7   :  { %v741_v33 = vadd.f32 %v740_v31, %v739_v19  ;;  %v749_v34 = vrot.slane %v748_v24, 1 }
 0xfe9   :  { %v742_v36 = vmul.f32 %v741_v33, %v1210_v53  ;;  %v750_v37 = vadd.f32 %v749_v34, %v748_v24 }
 0xfeb   :  { %v751_v39 = vmul.f32 %v750_v37, %v1210_v53  ;;  %v752_v40 = vmul.f32 %v742_v36, %v742_v36  ;;  %v755_v54 = vsub.f32 %v731_v18, %v742_v36 }
 0xfed   :  { %v753_v42 = vsub.f32 %v751_v39, %v752_v40 }
 0xfef   :  { %v754_v43 = vmax.f32 %v753_v42, 0.0 }
 0xff1   :  { %v756_v44 = vadd.f32 1e-05, %v754_v43 }
 0xff3   :  { %1023 = vrsqrt.f32 %v756_v44  ;;  %vm763_vm13 = vweird.f32 %v756_v44 }
 0xff9   :  { %v1024_v45 = vpop.eup %1023 }
 0xffa   :  { %v758_v46 = vmul.f32 %v1024_v45, %v756_v44  ;;  %vm764_vm12 = vweird.f32 %v1024_v45 }
 0xffb   :  { %vm765_vm14 = vmor %vm763_vm13, %vm764_vm12 }
 0xffc   :  { %v759_v47 = vmul.f32 %v1024_v45, %v758_v46 }
 0xffe   :  { %v760_v48 = vmul.f32 0.5, %v759_v47 }
0x1000   :  { %v761_v51 = vsub.f32 1.5, %v760_v48 }
0x1002   :  { %v762_v52 = vmul.f32 %v1024_v45, %v761_v51 }
0x1004   :  { %v766_v25 = vsel %vm765_vm14, %v1024_v45, %v762_v52 }
0x1005   :  { %v767_v56 = vmul.f32 %v766_v25, %v755_v54 }
0x1007   :  { %v769_v57 = vmul.f32 %v768_v55, %v767_v56 }
0x1009   :  { %v771_v58 = vadd.f32 %v770_v49, %v769_v57 }
0x100b   :  { %v772_v59 = vmax.f32 %v771_v58, 0.0 }
0x100d   :  { %946 = vmatmul.msk.f32.vlgmr.msrb.gmra.mxu0 %vm699_vm8, %v772_v59 }
0x108a   :  { %v798_v60 = vpop.f32.mrf.mxu0 }
0x108b   :  { %v801_v61 = vsel %vm640_vm1, %v798_v60, 0.0  ;;  %v809_v62 = vmul.f32 %v798_v60, %v798_v60 }
0x108c   :  { %v802_v63 = vrot.slane %v801_v61, 4 }
0x108d   :  { %v810_v1 = vsel %vm640_vm1, %v809_v62, 0.0  ;;  %v841_v62 = vld [vmem:[#allocation5 + $0x300] sm:$0x3] }
0x108e   :  { %v803_v2 = vadd.f32 %v802_v63, %v801_v61  ;;  %v811_v3 = vrot.slane %v810_v1, 4 }
0x1090   :  { %v804_v4 = vrot.slane %v803_v2, 2  ;;  %v812_v5 = vadd.f32 %v811_v3, %v810_v1  ;;  %v899_v3 = vperm.slane %v841_v62, 0 }
0x1092   :  { %v805_v6 = vadd.f32 %v804_v4, %v803_v2  ;;  %v813_v7 = vrot.slane %v812_v5, 2 }
0x1094   :  { %v806_v8 = vrot.slane %v805_v6, 1  ;;  %v814_v9 = vadd.f32 %v813_v7, %v812_v5 }
0x1096   :  { %v807_v10 = vadd.f32 %v806_v8, %v805_v6  ;;  %v815_v0 = vrot.slane %v814_v9, 1 }
0x1098   :  { %v808_v11 = vmul.f32 %v807_v10, %v1210_v53  ;;  %v816_v12 = vadd.f32 %v815_v0, %v814_v9 }
0x109a   :  { %v817_v14 = vmul.f32 %v816_v12, %v1210_v53  ;;  %v818_v15 = vmul.f32 %v808_v11, %v808_v11  ;;  %v821_v19 = vsub.f32 %v798_v60, %v808_v11 }
0x109c   :  { %v819_v17 = vsub.f32 %v817_v14, %v818_v15 }
0x109e   :  { %v820_v18 = vmax.f32 %v819_v17, 0.0 }
0x10a0   :  { %v822_v20 = vadd.f32 1e-05, %v820_v18 }
0x10a2   :  { %1025 = vrsqrt.f32 %v822_v20  ;;  %vm829_vm0 = vweird.f32 %v822_v20 }
0x10a8   :  { %v1026_v21 = vpop.eup %1025 }
0x10a9   :  { %v824_v22 = vmul.f32 %v1026_v21, %v822_v20  ;;  %vm830_vm15 = vweird.f32 %v1026_v21 }
0x10aa   :  { %vm831_vm1 = vmor %vm829_vm0, %vm830_vm15 }
0x10ab   :  { %v825_v23 = vmul.f32 %v1026_v21, %v824_v22 }
0x10ad   :  { %v826_v26 = vmul.f32 0.5, %v825_v23 }
0x10af   :  { %v827_v28 = vsub.f32 1.5, %v826_v26 }
0x10b1   :  { %v828_v29 = vmul.f32 %v1026_v21, %v827_v28 }
0x10b3   :  { %v832_v31 = vsel %vm831_vm1, %v1026_v21, %v828_v29 }
0x10b4   :  { %v833_v24 = vmul.f32 %v832_v31, %v821_v19 }
0x10b6   :  { %v835_v33 = vmul.f32 %v834_v30, %v833_v24 }
0x10b8   :  { %v837_v34 = vadd.f32 %v836_v32, %v835_v33 }
0x10ba   :  { %v838_v35 = vmax.f32 %v837_v34, 0.0 }
0x10bc   :  { %947 = vmatmul.msk.f32.vlgmr.msrb.gmra.mxu1 %vm175_vm6, %v838_v35 }
0x1139   :  { %v862_v36 = vpop.f32.mrf.mxu1 }
0x113a   :  { %v866_v37 = vsel %vm865_vm2, %v862_v36, 0.0  ;;  %v874_v38 = vmul.f32 %v862_v36, %v862_v36 }
0x113b   :  { %v867_v39 = vrot.slane %v866_v37, 4 }
0x113c   :  { %v875_v40 = vsel %vm865_vm2, %v874_v38, 0.0 }
0x113d   :  { %v868_v41 = vadd.f32 %v867_v39, %v866_v37  ;;  %v876_v42 = vrot.slane %v875_v40, 4 }
0x113f   :  { %v869_v43 = vrot.slane %v868_v41, 2  ;;  %v877_v44 = vadd.f32 %v876_v42, %v875_v40 }
0x1141   :  { %v870_v45 = vadd.f32 %v869_v43, %v868_v41  ;;  %v878_v46 = vrot.slane %v877_v44, 2 }
0x1143   :  { %v871_v47 = vrot.slane %v870_v45, 1  ;;  %v879_v48 = vadd.f32 %v878_v46, %v877_v44 }
0x1145   :  { %v872_v50 = vadd.f32 %v871_v47, %v870_v45  ;;  %v880_v51 = vrot.slane %v879_v48, 1 }
0x1147   :  { %v873_v52 = vmul.f32 %v872_v50, %v1210_v53  ;;  %v881_v54 = vadd.f32 %v880_v51, %v879_v48 }
0x1149   :  { %v882_v55 = vmul.f32 %v881_v54, %v1210_v53  ;;  %v883_v25 = vmul.f32 %v873_v52, %v873_v52  ;;  %v886_v2 = vsub.f32 %v862_v36, %v873_v52  ;;  %v901_v53 = vperm.slane %v841_v62, 1 }
0x114b   :  { %v884_v56 = vsub.f32 %v882_v55, %v883_v25 }
0x114d   :  { %v885_v49 = vmax.f32 %v884_v56, 0.0 }
0x114f   :  { %v887_v57 = vadd.f32 1e-05, %v885_v49 }
0x1151   :  { %1027 = vrsqrt.f32 %v887_v57  ;;  %vm894_vm3 = vweird.f32 %v887_v57 }
0x1157   :  { %v1028_v58 = vpop.eup %1027 }
0x1158   :  { %v889_v59 = vmul.f32 %v1028_v58, %v887_v57  ;;  %vm895_vm6 = vweird.f32 %v1028_v58 }
0x1159   :  { %vm896_vm4 = vmor %vm894_vm3, %vm895_vm6 }
0x115a   :  { %v890_v60 = vmul.f32 %v1028_v58, %v889_v59 }
0x115c   :  { %v891_v61 = vmul.f32 0.5, %v890_v60 }
0x115e   :  { %v892_v63 = vsub.f32 1.5, %v891_v61 }
0x1160   :  { %v893_v1 = vmul.f32 %v1028_v58, %v892_v63 }
0x1162   :  { %v897_v4 = vsel %vm896_vm4, %v1028_v58, %v893_v1 }
0x1163   :  { %v898_v5 = vmul.f32 %v897_v4, %v886_v2 }
0x1165   :  { %v900_v6 = vmul.f32 %v899_v3, %v898_v5 }
0x1167   :  { %v902_v7 = vadd.f32 %v901_v53, %v900_v6 }
0x1169   :  { %1029 = vtanh.f32 %v902_v7 }
0x116f   :  { %v1030_v8 = vpop.eup %1029 }
0x1170   :  { %v904_v9 = vmul.f32 2.0, %v1030_v8 }
0x1172   :  { %905 = vst.msk [vmem:[#allocation7] sm:$0xf] %vm865_vm2, %v904_v9 }
0x1173   :  { %916 = dma.vmem_to_hbm [thread:$0]  %s912_s28, 64, %s914_s3, [#allocation4]  }
0x1174   :  { %1107 = dma.done.wait [#allocation4], 64  }
0x1175   :  { %1108 = vsyncadd [#allocation4], 4294967232 }
0x1176   :  { %921 = vsyncpa [#allocation3], 1 }
0x1177   :  { %922 = vsyncpa [#allocation6], 1 }
0x1178   :  { %923 = vsyncpa [#allocation4], 1 }

</bundles_post_ra>
